<compile_context>
chip_gen: v5e
topology: v5e:2x2
jax: 0.10.0
libtpu: 0.0.40
codegen_flags: <defaults>
</compile_context>

<pallas_src>
import jax
import jax.numpy as jnp
import numpy as np
from jax import lax
from jax.experimental import pallas as pl
from jax.experimental.pallas import tpu as pltpu

BN_EPS = 1e-5

VMEM_SPEC = pl.BlockSpec(memory_space=pltpu.MemorySpace.VMEM)
SMEM_SPEC = pl.BlockSpec(memory_space=pltpu.MemorySpace.SMEM)

# argument order shared by the kernel signature / in_specs / wrapper
_ARG_ORDER = (
    "eps", "x", "eattr", "src_col", "dst_row", "batch_col", "batch_row", "gap",
    "atom_w", "atom_b",
    "edge_w", "edge_b", "mlp_w1", "mlp_b1", "mlp_w2", "mlp_b2",
    "gate_w1", "gate_b1", "gate_w2", "gate_b2",
    "head_w1h", "head_w1g", "head_b1", "head_w2", "head_b2", "head_w3", "head_b3",
)


def _mm(a, b):
    # bf16 MXU operands, f32 accumulation.  Weights are already bf16; activations are
    # kept f32 for the VPU/EUP element-wise path and cast only at the dot.
    return jnp.dot(a.astype(jnp.bfloat16), b.astype(jnp.bfloat16),
                   preferred_element_type=jnp.float32)


# ------------------------------- fused kernel --------------------------------

def _fused_gnn_kernel(
    eps_ref,                                   # SMEM (L,)  f32   GINE train_eps
    x_ref, eattr_ref,                          # [N,DP] f32, [E,DP] f32   (zero-padded)
    src_col_ref, dst_row_ref,                  # [E,1] i32, [1,E] i32
    batch_col_ref, batch_row_ref,              # [N,1] i32, [1,N] i32
    gap_ref,                                   # [G,DP] f32  (graph-level feature, 10 real)
    atom_w_ref, atom_b_ref,                    # [DP,DP] bf16, [1,DP] f32
    edge_w_ref, edge_b_ref,                    # [L,DP,DP] bf16, [L,1,DP] f32
    mlp_w1_ref, mlp_b1_ref,                    # [L,DP,DP] bf16, [L,1,DP] f32
    mlp_w2_ref, mlp_b2_ref,                    # [L,DP,DP] bf16, [L,1,DP] f32  (BN folded)
    gate_w1_ref, gate_b1_ref,                  # [DP,DP] bf16, [1,DP] f32      (BN folded)
    gate_w2_ref, gate_b2_ref,                  # [DP,DP] bf16 (col 0 real), [1,DP] f32
    head_w1h_ref, head_w1g_ref, head_b1_ref,   # split head W1 (h_graph rows / gap rows)
    head_w2_ref, head_b2_ref,
    head_w3_ref, head_b3_ref,
    out_ref,                                   # [G,DP] f32 (col 0 = prediction)
):
    num_layer = edge_w_ref.shape[0]
    N = x_ref.shape[0]
    E = eattr_ref.shape[0]
    G = gap_ref.shape[0]

    # Edge incidence one-hots built in VMEM from compact indices (0/1 exact in bf16).
    src_oh = jnp.where(
        lax.broadcasted_iota(jnp.int32, (E, N), 1) == src_col_ref[...],
        1.0, 0.0).astype(jnp.bfloat16)                               # [E,N] gather matrix
    dst_ohT = jnp.where(
        lax.broadcasted_iota(jnp.int32, (N, E), 0) == dst_row_ref[...],
        1.0, 0.0).astype(jnp.bfloat16)                               # [N,E] scatter-add matrix

    # atom encoder: Linear(92 -> D)
    h = _mm(x_ref[...], atom_w_ref[...]) + atom_b_ref[...]           # [N,DP] f32

    # GINE layers (eval-mode BatchNorm folded into mlp_W2/b2; dropout(p) == identity here)
    for l in range(num_layer):
        e_emb = _mm(eattr_ref[...], edge_w_ref[l]) + edge_b_ref[l]   # [E,DP] edge embedding
        x_src = _mm(src_oh, h)                                       # gather h[src]
        msg = jnp.maximum(x_src + e_emb, 0.0)                        # relu(h[src] + e)
        aggr = _mm(dst_ohT, msg)                                     # scatter-add onto dst
        z = (1.0 + eps_ref[l]) * h + aggr                            # eps from SMEM
        h1 = jnp.maximum(_mm(z, mlp_w1_ref[l]) + mlp_b1_ref[l], 0.0)
        h = _mm(h1, mlp_w2_ref[l]) + mlp_b2_ref[l]                   # Linear + folded BN
        if l != num_layer - 1:
            h = jnp.maximum(h, 0.0)                                  # inter-layer ReLU

    # GlobalAttention pooling; gate_nn = Linear -> BN -> ReLU -> Linear(D -> 1) fused in.
    g1 = jnp.maximum(_mm(h, gate_w1_ref[...]) + gate_b1_ref[...], 0.0)   # [N,DP]
    gate_full = _mm(g1, gate_w2_ref[...]) + gate_b2_ref[...]             # [N,DP] (col 0 real)
    gate = gate_full[:, 0:1]                                             # [N,1] logits

    in_graph = (lax.broadcasted_iota(jnp.int32, (N, G), 1)
                == batch_col_ref[...])                                   # [N,G] membership
    logits = jnp.where(in_graph, gate, -1e30)                            # mask BEFORE exp
    gmax = jnp.max(logits, axis=0, keepdims=True)                        # [1,G] stability
    ex = jnp.where(in_graph, jnp.exp(logits - gmax), 0.0)                # [N,G]
    denom = jnp.sum(ex, axis=0, keepdims=True)                           # [1,G]
    w_node = jnp.sum(ex / denom, axis=1, keepdims=True)                  # [N,1] softmax weight

    graph_oh = jnp.where(
        lax.broadcasted_iota(jnp.int32, (G, N), 0) == batch_row_ref[...],
        1.0, 0.0).astype(jnp.bfloat16)                                   # [G,N]
    h_graph = _mm(graph_oh, w_node * h)                                  # [G,DP] weighted sum

    # head MLP; concat([h_graph, gap]) expressed as a split matmul (no in-kernel concat)
    z1 = jnp.maximum(_mm(h_graph, head_w1h_ref[...])
                     + _mm(gap_ref[...], head_w1g_ref[...])
                     + head_b1_ref[...], 0.0)                            # [G,DP]
    z2 = jnp.maximum(_mm(z1, head_w2_ref[...]) + head_b2_ref[...], 0.0)  # [G,DP]
    out_ref[...] = _mm(z2, head_w3_ref[...]) + head_b3_ref[...]          # [G,DP] (col 0 real)


# ------------------------------ operand packing -------------------------------

def _pad2(a, rows, cols, dtype):
    out = jnp.zeros((rows, cols), dtype)
    return out.at[: a.shape[0], : a.shape[1]].set(a.astype(dtype))


def _fold_bn(w, b, gamma, beta, mean, var):
    scale = gamma / jnp.sqrt(var + BN_EPS)
    return w * scale[None, :], b * scale + (beta - mean * scale)


def prepare_operands(params, x, src, dst, edge_attr, batch, gap):
    """Pad / fold / cast everything once on the XLA side; all kernel operands built here."""
    N, E, G = x.shape[0], src.shape[0], gap.shape[0]
    D = params["atom_W"].shape[1]
    hp = params["hidden0"]
    dmax = max(x.shape[1], edge_attr.shape[1], gap.shape[1], D,
               hp["W1"].shape[1], hp["W2"].shape[0], hp["W2"].shape[1])
    DP = ((dmax + 127) // 128) * 128                       # lane-dense padded feature width

    f32, bf16, i32 = jnp.float32, jnp.bfloat16, jnp.int32

    def pw(w):                                             # weight -> [DP,DP] bf16
        return _pad2(w, DP, DP, bf16)

    def pb(b):                                             # bias -> [1,DP] f32
        return _pad2(jnp.reshape(b, (1, -1)), 1, DP, f32)

    ops = {
        "eps": jnp.stack([jnp.asarray(lp["eps"], f32) for lp in params["layers"]]),
        "x": _pad2(x, N, DP, f32),
        "eattr": _pad2(edge_attr, E, DP, f32),
        "src_col": src.astype(i32).reshape(E, 1),
        "dst_row": dst.astype(i32).reshape(1, E),
        "batch_col": batch.astype(i32).reshape(N, 1),
        "batch_row": batch.astype(i32).reshape(1, N),
        "gap": _pad2(gap, G, DP, f32),
        "atom_w": pw(params["atom_W"]),
        "atom_b": pb(params["atom_b"]),
    }

    ew, eb, w1, b1, w2, b2 = [], [], [], [], [], []
    for lp in params["layers"]:
        ew.append(pw(lp["edge_W"])); eb.append(pb(lp["edge_b"]))
        w1.append(pw(lp["mlp_W1"])); b1.append(pb(lp["mlp_b1"]))
        w2f, b2f = _fold_bn(lp["mlp_W2"], lp["mlp_b2"],
                            lp["bn_gamma"], lp["bn_beta"], lp["bn_mean"], lp["bn_var"])
        w2.append(pw(w2f)); b2.append(pb(b2f))
    ops["edge_w"] = jnp.stack(ew); ops["edge_b"] = jnp.stack(eb)
    ops["mlp_w1"] = jnp.stack(w1); ops["mlp_b1"] = jnp.stack(b1)
    ops["mlp_w2"] = jnp.stack(w2); ops["mlp_b2"] = jnp.stack(b2)

    gp = params["gate"]
    gw1f, gb1f = _fold_bn(gp["W1"], gp["b1"], gp["bn_gamma"], gp["bn_beta"],
                          gp["bn_mean"], gp["bn_var"])
    ops["gate_w1"] = pw(gw1f); ops["gate_b1"] = pb(gb1f)
    ops["gate_w2"] = pw(gp["W2"]); ops["gate_b2"] = pb(gp["b2"])

    ops["head_w1h"] = pw(hp["W1"][:D, :])                  # rows for h_graph features
    ops["head_w1g"] = pw(hp["W1"][D:, :])                  # rows for the 10-dim gap feature
    ops["head_b1"] = pb(hp["b1"])
    ops["head_w2"] = pw(hp["W2"]); ops["head_b2"] = pb(hp["b2"])
    ops["head_w3"] = pw(hp["W3"]); ops["head_b3"] = pb(hp["b3"])
    return ops


def gnn_graph_forward(params, x, src, dst, edge_attr, batch, gap):
    ops = prepare_operands(params, x, src, dst, edge_attr, batch, gap)
    args = [ops[k] for k in _ARG_ORDER]
    G, DP = ops["gap"].shape
    out = pl.pallas_call(
        _fused_gnn_kernel,
        out_shape=jax.ShapeDtypeStruct((G, DP), jnp.float32),
        in_specs=[SMEM_SPEC] + [VMEM_SPEC] * (len(args) - 1),
        out_specs=VMEM_SPEC,
        compiler_params=pltpu.CompilerParams(vmem_limit_bytes=32 * 1024 * 1024),
    )(*args)
    num_classes = params["hidden0"]["W3"].shape[1]
    return out[:, :num_classes]


# ------------------------------ parameter init --------------------------------

def init_params(key, emb_dim, num_layer, atom_dim=92, edge_dim=50, gap_dim=10,
                num_classes=1):
    keys = iter(jax.random.split(key, 64))

    def lin(din, dout):
        s = 1.0 / np.sqrt(din)
        w = jax.random.uniform(next(keys), (din, dout), jnp.float32, -s, s)
        b = jax.random.uniform(next(keys), (dout,), jnp.float32, -s, s)
        return w, b

    params = {}
    params["atom_W"], params["atom_b"] = lin(atom_dim, emb_dim)

    layers = []
    for _ in range(num_layer):
        eW, eb = lin(edge_dim, emb_dim)
        w1, b1 = lin(emb_dim, emb_dim)
        w2, b2 = lin(emb_dim, emb_dim)
        layers.append(dict(
            edge_W=eW, edge_b=eb, eps=jnp.float32(0.0),            # train_eps init = 0
            mlp_W1=w1, mlp_b1=b1, mlp_W2=w2, mlp_b2=b2,
            bn_gamma=jnp.ones((emb_dim,), jnp.float32),
            bn_beta=jnp.zeros((emb_dim,), jnp.float32),
            bn_mean=jnp.zeros((emb_dim,), jnp.float32),
            bn_var=jnp.ones((emb_dim,), jnp.float32)))
    params["layers"] = layers

    gW1, gb1 = lin(emb_dim, emb_dim)
    gW2, gb2 = lin(emb_dim, 1)
    params["gate"] = dict(
        W1=gW1, b1=gb1, W2=gW2, b2=gb2,
        bn_gamma=jnp.ones((emb_dim,), jnp.float32),
        bn_beta=jnp.zeros((emb_dim,), jnp.float32),
        bn_mean=jnp.zeros((emb_dim,), jnp.float32),
        bn_var=jnp.ones((emb_dim,), jnp.float32))

    hW1, hb1 = lin(emb_dim + gap_dim, (emb_dim + gap_dim) * 2)
    hW2, hb2 = lin((emb_dim + gap_dim) * 2, emb_dim + gap_dim)
    hW3, hb3 = lin(emb_dim + gap_dim, num_classes)
    params["hidden0"] = dict(W1=hW1, b1=hb1, W2=hW2, b2=hb2, W3=hW3, b3=hb3)
    return params


# -------------------------------- references ----------------------------------

def matched_reference(ops):
    """Pure-JAX transcription of the kernel's mixed-precision math (tight check)."""
    mm = lambda a, b: jnp.dot(a.astype(jnp.bfloat16), b.astype(jnp.bfloat16),
                              preferred_element_type=jnp.float32)
    x, eattr, gap = ops["x"], ops["eattr"], ops["gap"]
    N, E, G = x.shape[0], eattr.shape[0], gap.shape[0]
    L = ops["edge_w"].shape[0]

    src_oh = jnp.where(jnp.arange(N)[None, :] == ops["src_col"], 1.0, 0.0).astype(jnp.bfloat16)
    dst_ohT = jnp.where(jnp.arange(N)[:, None] == ops["dst_row"], 1.0, 0.0).astype(jnp.bfloat16)

    h = mm(x, ops["atom_w"]) + ops["atom_b"]
    for l in range(L):
        e_emb = mm(eattr, ops["edge_w"][l]) + ops["edge_b"][l]
        msg = jnp.maximum(mm(src_oh, h) + e_emb, 0.0)
        z = (1.0 + ops["eps"][l]) * h + mm(dst_ohT, msg)
        h1 = jnp.maximum(mm(z, ops["mlp_w1"][l]) + ops["mlp_b1"][l], 0.0)
        h = mm(h1, ops["mlp_w2"][l]) + ops["mlp_b2"][l]
        if l != L - 1:
            h = jnp.maximum(h, 0.0)

    g1 = jnp.maximum(mm(h, ops["gate_w1"]) + ops["gate_b1"], 0.0)
    gate = (mm(g1, ops["gate_w2"]) + ops["gate_b2"])[:, 0:1]
    in_graph = jnp.arange(G)[None, :] == ops["batch_col"]
    logits = jnp.where(in_graph, gate, -1e30)
    gmax = jnp.max(logits, axis=0, keepdims=True)
    ex = jnp.where(in_graph, jnp.exp(logits - gmax), 0.0)
    w_node = jnp.sum(ex / jnp.sum(ex, axis=0, keepdims=True), axis=1, keepdims=True)
    graph_oh = jnp.where(jnp.arange(G)[:, None] == ops["batch_row"], 1.0, 0.0).astype(jnp.bfloat16)
    h_graph = mm(graph_oh, w_node * h)

    z1 = jnp.maximum(mm(h_graph, ops["head_w1h"]) + mm(gap, ops["head_w1g"]) + ops["head_b1"], 0.0)
    z2 = jnp.maximum(mm(z1, ops["head_w2"]) + ops["head_b2"], 0.0)
    return mm(z2, ops["head_w3"]) + ops["head_b3"]


def reference_forward(params, x, src, dst, edge_attr, batch, gap):
    """Full-f32 reference mirroring the PyTorch module (semantic check)."""
    def lin(v, w, b):
        return v @ w + b

    G = gap.shape[0]
    num_layer = len(params["layers"])
    h = lin(x, params["atom_W"], params["atom_b"])
    for l in range(num_layer):
        p = params["layers"][l]
        e = lin(edge_attr, p["edge_W"], p["edge_b"])
        msg = jax.nn.relu(h[src] + e)
        aggr = jnp.zeros_like(h).at[dst].add(msg)
        z = (1.0 + p["eps"]) * h + aggr
        hh = lin(jax.nn.relu(lin(z, p["mlp_W1"], p["mlp_b1"])), p["mlp_W2"], p["mlp_b2"])
        hh = (hh - p["bn_mean"]) / jnp.sqrt(p["bn_var"] + BN_EPS) * p["bn_gamma"] + p["bn_beta"]
        if l != num_layer - 1:
            hh = jax.nn.relu(hh)
        h = hh
    gp = params["gate"]
    g1 = lin(h, gp["W1"], gp["b1"])
    g1 = (g1 - gp["bn_mean"]) / jnp.sqrt(gp["bn_var"] + BN_EPS) * gp["bn_gamma"] + gp["bn_beta"]
    g1 = jax.nn.relu(g1)
    gate = lin(g1, gp["W2"], gp["b2"])[:, 0]
    gmax = jnp.full((G,), -1e30, jnp.float32).at[batch].max(gate)
    e = jnp.exp(gate - gmax[batch])
    denom = jnp.zeros((G,), jnp.float32).at[batch].add(e)
    w = e / denom[batch]
    h_graph = jnp.zeros((G, h.shape[1]), jnp.float32).at[batch].add(w[:, None] * h)
    hcat = jnp.concatenate([h_graph, gap], axis=1)
    hp = params["hidden0"]
    o = jax.nn.relu(lin(hcat, hp["W1"], hp["b1"]))
    o = jax.nn.relu(lin(o, hp["W2"], hp["b2"]))
    return lin(o, hp["W3"], hp["b3"])


# ----------------------------------- main --------------------------------------

if __name__ == "__main__":
    emb_dim, num_layer = 32, 4
    N, E, G = 16, 40, 2          # 16 nodes, 40 edges, 2 graphs in the batch

    key = jax.random.PRNGKey(0)
    kx, ke, ks, kd, kg, kp = jax.random.split(key, 6)

    x = jax.random.normal(kx, (N, 92), jnp.float32)              # node features
    edge_attr = jax.random.normal(ke, (E, 50), jnp.float32)      # edge features
    # within-graph random edges: 20 in graph 0 (nodes 0..7), 20 in graph 1 (nodes 8..15)
    src0 = jax.random.randint(ks, (E // 2,), 0, 8)
    dst0 = jax.random.randint(kd, (E // 2,), 0, 8)
    src = jnp.concatenate([src0, src0 + 8]).astype(jnp.int32)
    dst = jnp.concatenate([dst0, dst0 + 8]).astype(jnp.int32)
    batch = jnp.concatenate([jnp.zeros((8,), jnp.int32), jnp.ones((8,), jnp.int32)])
    gap = jax.random.normal(kg, (G, 10), jnp.float32)            # batched_data.g

    params = init_params(kp, emb_dim, num_layer)

    fwd = jax.jit(gnn_graph_forward)
    out = jax.block_until_ready(fwd(params, x, src, dst, edge_attr, batch, gap))

    # (1) tight check against a pure-JAX transcription of the same mixed-precision math
    ops = prepare_operands(params, x, src, dst, edge_attr, batch, gap)
    ref_matched = np.asarray(matched_reference(ops))[:, :1]
    np.testing.assert_allclose(np.asarray(out), ref_matched, rtol=2e-3, atol=2e-3)

    # (2) semantic check against the full-f32 reference of the PyTorch module
    #     (bf16 MXU operands -> ~1% level deviations expected)
    ref_f32 = np.asarray(reference_forward(params, x, src, dst, edge_attr, batch, gap))
    np.testing.assert_allclose(np.asarray(out), ref_f32, rtol=5e-2, atol=5e-2)

    print("KERNEL_OK")
</pallas_src>

<mosaic_0001>
module attributes {stable_mosaic.version = 11 : i64} {
  func.func @_fused_gnn_kernel(%arg0: memref<4xf32, #tpu.memory_space<smem>>, %arg1: memref<16x128xf32, #tpu.memory_space<vmem>>, %arg2: memref<40x128xf32, #tpu.memory_space<vmem>>, %arg3: memref<40x1xi32, #tpu.memory_space<vmem>>, %arg4: memref<1x40xi32, #tpu.memory_space<vmem>>, %arg5: memref<16x1xi32, #tpu.memory_space<vmem>>, %arg6: memref<1x16xi32, #tpu.memory_space<vmem>>, %arg7: memref<2x128xf32, #tpu.memory_space<vmem>>, %arg8: memref<128x128xbf16, #tpu.memory_space<vmem>>, %arg9: memref<1x128xf32, #tpu.memory_space<vmem>>, %arg10: memref<4x128x128xbf16, #tpu.memory_space<vmem>>, %arg11: memref<4x1x128xf32, #tpu.memory_space<vmem>>, %arg12: memref<4x128x128xbf16, #tpu.memory_space<vmem>>, %arg13: memref<4x1x128xf32, #tpu.memory_space<vmem>>, %arg14: memref<4x128x128xbf16, #tpu.memory_space<vmem>>, %arg15: memref<4x1x128xf32, #tpu.memory_space<vmem>>, %arg16: memref<128x128xbf16, #tpu.memory_space<vmem>>, %arg17: memref<1x128xf32, #tpu.memory_space<vmem>>, %arg18: memref<128x128xbf16, #tpu.memory_space<vmem>>, %arg19: memref<1x128xf32, #tpu.memory_space<vmem>>, %arg20: memref<128x128xbf16, #tpu.memory_space<vmem>>, %arg21: memref<128x128xbf16, #tpu.memory_space<vmem>>, %arg22: memref<1x128xf32, #tpu.memory_space<vmem>>, %arg23: memref<128x128xbf16, #tpu.memory_space<vmem>>, %arg24: memref<1x128xf32, #tpu.memory_space<vmem>>, %arg25: memref<128x128xbf16, #tpu.memory_space<vmem>>, %arg26: memref<1x128xf32, #tpu.memory_space<vmem>>, %arg27: memref<2x128xf32, #tpu.memory_space<vmem>>) attributes {dimension_semantics = [], scalar_prefetch = 0 : i64, scratch_operands = 0 : i64, tpu.core_type = #tpu.core_type<tc>} {
    %0 = tpu.iota {dimensions = array<i32: 1>} : vector<40x16xi32>
    %c0 = arith.constant 0 : index
    %c0_0 = arith.constant 0 : index
    %1 = vector.load %arg3[%c0, %c0_0] : memref<40x1xi32, #tpu.memory_space<vmem>>, vector<40x1xi32>
    %2 = vector.broadcast %1 : vector<40x1xi32> to vector<40x16xi32>
    %3 = arith.cmpi eq, %0, %2 : vector<40x16xi32>
    %cst = arith.constant 1.000000e+00 : f32
    %cst_1 = arith.constant 0.000000e+00 : f32
    %4 = vector.broadcast %cst : f32 to vector<40x16xf32>
    %5 = vector.broadcast %cst_1 : f32 to vector<40x16xf32>
    %6 = arith.select %3, %4, %5 : vector<40x16xi1>, vector<40x16xf32>
    %7 = arith.truncf %6 : vector<40x16xf32> to vector<40x16xbf16>
    %8 = tpu.iota {dimensions = array<i32: 0>} : vector<16x40xi32>
    %c0_2 = arith.constant 0 : index
    %c0_3 = arith.constant 0 : index
    %9 = vector.load %arg4[%c0_2, %c0_3] : memref<1x40xi32, #tpu.memory_space<vmem>>, vector<1x40xi32>
    %10 = vector.broadcast %9 : vector<1x40xi32> to vector<16x40xi32>
    %11 = arith.cmpi eq, %8, %10 : vector<16x40xi32>
    %cst_4 = arith.constant 1.000000e+00 : f32
    %cst_5 = arith.constant 0.000000e+00 : f32
    %12 = vector.broadcast %cst_4 : f32 to vector<16x40xf32>
    %13 = vector.broadcast %cst_5 : f32 to vector<16x40xf32>
    %14 = arith.select %11, %12, %13 : vector<16x40xi1>, vector<16x40xf32>
    %15 = arith.truncf %14 : vector<16x40xf32> to vector<16x40xbf16>
    %c0_6 = arith.constant 0 : index
    %c0_7 = arith.constant 0 : index
    %16 = vector.load %arg1[%c0_6, %c0_7] : memref<16x128xf32, #tpu.memory_space<vmem>>, vector<16x128xf32>
    %c0_8 = arith.constant 0 : index
    %c0_9 = arith.constant 0 : index
    %17 = vector.load %arg8[%c0_8, %c0_9] : memref<128x128xbf16, #tpu.memory_space<vmem>>, vector<128x128xbf16>
    %18 = arith.truncf %16 : vector<16x128xf32> to vector<16x128xbf16>
    %cst_10 = arith.constant dense<0.000000e+00> : vector<16x128xf32>
    %19 = tpu.matmul %18, %17, %cst_10 {dimension_numbers = #tpu.dot_dimension_numbers<[1], [0], [0], [1], [0, 0, 1, 1], [], []>} : vector<16x128xbf16>, vector<128x128xbf16>, vector<16x128xf32> -> vector<16x128xf32>
    %c0_11 = arith.constant 0 : index
    %c0_12 = arith.constant 0 : index
    %20 = vector.load %arg9[%c0_11, %c0_12] : memref<1x128xf32, #tpu.memory_space<vmem>>, vector<1x128xf32>
    %21 = vector.broadcast %20 : vector<1x128xf32> to vector<16x128xf32>
    %22 = arith.addf %19, %21 : vector<16x128xf32>
    %c0_13 = arith.constant 0 : index
    %c0_14 = arith.constant 0 : index
    %23 = vector.load %arg2[%c0_13, %c0_14] : memref<40x128xf32, #tpu.memory_space<vmem>>, vector<40x128xf32>
    %c0_15 = arith.constant 0 : index
    %c0_16 = arith.constant 0 : index
    %c0_17 = arith.constant 0 : index
    %24 = vector.load %arg10[%c0_15, %c0_16, %c0_17] : memref<4x128x128xbf16, #tpu.memory_space<vmem>>, vector<1x128x128xbf16>
    %25 = vector.shape_cast %24 : vector<1x128x128xbf16> to vector<128x128xbf16>
    %26 = arith.truncf %23 : vector<40x128xf32> to vector<40x128xbf16>
    %cst_18 = arith.constant dense<0.000000e+00> : vector<40x128xf32>
    %27 = tpu.matmul %26, %25, %cst_18 {dimension_numbers = #tpu.dot_dimension_numbers<[1], [0], [0], [1], [0, 0, 1, 1], [], []>} : vector<40x128xbf16>, vector<128x128xbf16>, vector<40x128xf32> -> vector<40x128xf32>
    %c0_19 = arith.constant 0 : index
    %c0_20 = arith.constant 0 : index
    %c0_21 = arith.constant 0 : index
    %28 = vector.load %arg11[%c0_19, %c0_20, %c0_21] : memref<4x1x128xf32, #tpu.memory_space<vmem>>, vector<1x1x128xf32>
    %29 = vector.shape_cast %28 : vector<1x1x128xf32> to vector<1x128xf32>
    %30 = vector.broadcast %29 : vector<1x128xf32> to vector<40x128xf32>
    %31 = arith.addf %27, %30 : vector<40x128xf32>
    %32 = arith.truncf %22 : vector<16x128xf32> to vector<16x128xbf16>
    %cst_22 = arith.constant dense<0.000000e+00> : vector<40x128xf32>
    %33 = tpu.matmul %7, %32, %cst_22 {dimension_numbers = #tpu.dot_dimension_numbers<[1], [0], [0], [1], [0, 0, 1, 1], [], []>} : vector<40x16xbf16>, vector<16x128xbf16>, vector<40x128xf32> -> vector<40x128xf32>
    %34 = arith.addf %33, %31 : vector<40x128xf32>
    %cst_23 = arith.constant 0.000000e+00 : f32
    %35 = vector.broadcast %cst_23 : f32 to vector<40x128xf32>
    %36 = arith.maximumf %34, %35 : vector<40x128xf32>
    %37 = arith.truncf %36 : vector<40x128xf32> to vector<40x128xbf16>
    %cst_24 = arith.constant dense<0.000000e+00> : vector<16x128xf32>
    %38 = tpu.matmul %15, %37, %cst_24 {dimension_numbers = #tpu.dot_dimension_numbers<[1], [0], [0], [1], [0, 0, 1, 1], [], []>} : vector<16x40xbf16>, vector<40x128xbf16>, vector<16x128xf32> -> vector<16x128xf32>
    %c0_25 = arith.constant 0 : index
    %39 = memref.load %arg0[%c0_25] : memref<4xf32, #tpu.memory_space<smem>>
    %cst_26 = arith.constant 1.000000e+00 : f32
    %40 = arith.addf %cst_26, %39 : f32
    %41 = vector.broadcast %40 : f32 to vector<16x128xf32>
    %42 = arith.mulf %41, %22 : vector<16x128xf32>
    %43 = arith.addf %42, %38 : vector<16x128xf32>
    %c0_27 = arith.constant 0 : index
    %c0_28 = arith.constant 0 : index
    %c0_29 = arith.constant 0 : index
    %44 = vector.load %arg12[%c0_27, %c0_28, %c0_29] : memref<4x128x128xbf16, #tpu.memory_space<vmem>>, vector<1x128x128xbf16>
    %45 = vector.shape_cast %44 : vector<1x128x128xbf16> to vector<128x128xbf16>
    %46 = arith.truncf %43 : vector<16x128xf32> to vector<16x128xbf16>
    %cst_30 = arith.constant dense<0.000000e+00> : vector<16x128xf32>
    %47 = tpu.matmul %46, %45, %cst_30 {dimension_numbers = #tpu.dot_dimension_numbers<[1], [0], [0], [1], [0, 0, 1, 1], [], []>} : vector<16x128xbf16>, vector<128x128xbf16>, vector<16x128xf32> -> vector<16x128xf32>
    %c0_31 = arith.constant 0 : index
    %c0_32 = arith.constant 0 : index
    %c0_33 = arith.constant 0 : index
    %48 = vector.load %arg13[%c0_31, %c0_32, %c0_33] : memref<4x1x128xf32, #tpu.memory_space<vmem>>, vector<1x1x128xf32>
    %49 = vector.shape_cast %48 : vector<1x1x128xf32> to vector<1x128xf32>
    %50 = vector.broadcast %49 : vector<1x128xf32> to vector<16x128xf32>
    %51 = arith.addf %47, %50 : vector<16x128xf32>
    %cst_34 = arith.constant 0.000000e+00 : f32
    %52 = vector.broadcast %cst_34 : f32 to vector<16x128xf32>
    %53 = arith.maximumf %51, %52 : vector<16x128xf32>
    %c0_35 = arith.constant 0 : index
    %c0_36 = arith.constant 0 : index
    %c0_37 = arith.constant 0 : index
    %54 = vector.load %arg14[%c0_35, %c0_36, %c0_37] : memref<4x128x128xbf16, #tpu.memory_space<vmem>>, vector<1x128x128xbf16>
    %55 = vector.shape_cast %54 : vector<1x128x128xbf16> to vector<128x128xbf16>
    %56 = arith.truncf %53 : vector<16x128xf32> to vector<16x128xbf16>
    %cst_38 = arith.constant dense<0.000000e+00> : vector<16x128xf32>
    %57 = tpu.matmul %56, %55, %cst_38 {dimension_numbers = #tpu.dot_dimension_numbers<[1], [0], [0], [1], [0, 0, 1, 1], [], []>} : vector<16x128xbf16>, vector<128x128xbf16>, vector<16x128xf32> -> vector<16x128xf32>
    %c0_39 = arith.constant 0 : index
    %c0_40 = arith.constant 0 : index
    %c0_41 = arith.constant 0 : index
    %58 = vector.load %arg15[%c0_39, %c0_40, %c0_41] : memref<4x1x128xf32, #tpu.memory_space<vmem>>, vector<1x1x128xf32>
    %59 = vector.shape_cast %58 : vector<1x1x128xf32> to vector<1x128xf32>
    %60 = vector.broadcast %59 : vector<1x128xf32> to vector<16x128xf32>
    %61 = arith.addf %57, %60 : vector<16x128xf32>
    %cst_42 = arith.constant 0.000000e+00 : f32
    %62 = vector.broadcast %cst_42 : f32 to vector<16x128xf32>
    %63 = arith.maximumf %61, %62 : vector<16x128xf32>
    %c0_43 = arith.constant 0 : index
    %c0_44 = arith.constant 0 : index
    %64 = vector.load %arg2[%c0_43, %c0_44] : memref<40x128xf32, #tpu.memory_space<vmem>>, vector<40x128xf32>
    %c1 = arith.constant 1 : index
    %c0_45 = arith.constant 0 : index
    %c0_46 = arith.constant 0 : index
    %65 = vector.load %arg10[%c1, %c0_45, %c0_46] : memref<4x128x128xbf16, #tpu.memory_space<vmem>>, vector<1x128x128xbf16>
    %66 = vector.shape_cast %65 : vector<1x128x128xbf16> to vector<128x128xbf16>
    %67 = arith.truncf %64 : vector<40x128xf32> to vector<40x128xbf16>
    %cst_47 = arith.constant dense<0.000000e+00> : vector<40x128xf32>
    %68 = tpu.matmul %67, %66, %cst_47 {dimension_numbers = #tpu.dot_dimension_numbers<[1], [0], [0], [1], [0, 0, 1, 1], [], []>} : vector<40x128xbf16>, vector<128x128xbf16>, vector<40x128xf32> -> vector<40x128xf32>
    %c1_48 = arith.constant 1 : index
    %c0_49 = arith.constant 0 : index
    %c0_50 = arith.constant 0 : index
    %69 = vector.load %arg11[%c1_48, %c0_49, %c0_50] : memref<4x1x128xf32, #tpu.memory_space<vmem>>, vector<1x1x128xf32>
    %70 = vector.shape_cast %69 : vector<1x1x128xf32> to vector<1x128xf32>
    %71 = vector.broadcast %70 : vector<1x128xf32> to vector<40x128xf32>
    %72 = arith.addf %68, %71 : vector<40x128xf32>
    %73 = arith.truncf %63 : vector<16x128xf32> to vector<16x128xbf16>
    %cst_51 = arith.constant dense<0.000000e+00> : vector<40x128xf32>
    %74 = tpu.matmul %7, %73, %cst_51 {dimension_numbers = #tpu.dot_dimension_numbers<[1], [0], [0], [1], [0, 0, 1, 1], [], []>} : vector<40x16xbf16>, vector<16x128xbf16>, vector<40x128xf32> -> vector<40x128xf32>
    %75 = arith.addf %74, %72 : vector<40x128xf32>
    %cst_52 = arith.constant 0.000000e+00 : f32
    %76 = vector.broadcast %cst_52 : f32 to vector<40x128xf32>
    %77 = arith.maximumf %75, %76 : vector<40x128xf32>
    %78 = arith.truncf %77 : vector<40x128xf32> to vector<40x128xbf16>
    %cst_53 = arith.constant dense<0.000000e+00> : vector<16x128xf32>
    %79 = tpu.matmul %15, %78, %cst_53 {dimension_numbers = #tpu.dot_dimension_numbers<[1], [0], [0], [1], [0, 0, 1, 1], [], []>} : vector<16x40xbf16>, vector<40x128xbf16>, vector<16x128xf32> -> vector<16x128xf32>
    %c1_54 = arith.constant 1 : index
    %80 = memref.load %arg0[%c1_54] : memref<4xf32, #tpu.memory_space<smem>>
    %cst_55 = arith.constant 1.000000e+00 : f32
    %81 = arith.addf %cst_55, %80 : f32
    %82 = vector.broadcast %81 : f32 to vector<16x128xf32>
    %83 = arith.mulf %82, %63 : vector<16x128xf32>
    %84 = arith.addf %83, %79 : vector<16x128xf32>
    %c1_56 = arith.constant 1 : index
    %c0_57 = arith.constant 0 : index
    %c0_58 = arith.constant 0 : index
    %85 = vector.load %arg12[%c1_56, %c0_57, %c0_58] : memref<4x128x128xbf16, #tpu.memory_space<vmem>>, vector<1x128x128xbf16>
    %86 = vector.shape_cast %85 : vector<1x128x128xbf16> to vector<128x128xbf16>
    %87 = arith.truncf %84 : vector<16x128xf32> to vector<16x128xbf16>
    %cst_59 = arith.constant dense<0.000000e+00> : vector<16x128xf32>
    %88 = tpu.matmul %87, %86, %cst_59 {dimension_numbers = #tpu.dot_dimension_numbers<[1], [0], [0], [1], [0, 0, 1, 1], [], []>} : vector<16x128xbf16>, vector<128x128xbf16>, vector<16x128xf32> -> vector<16x128xf32>
    %c1_60 = arith.constant 1 : index
    %c0_61 = arith.constant 0 : index
    %c0_62 = arith.constant 0 : index
    %89 = vector.load %arg13[%c1_60, %c0_61, %c0_62] : memref<4x1x128xf32, #tpu.memory_space<vmem>>, vector<1x1x128xf32>
    %90 = vector.shape_cast %89 : vector<1x1x128xf32> to vector<1x128xf32>
    %91 = vector.broadcast %90 : vector<1x128xf32> to vector<16x128xf32>
    %92 = arith.addf %88, %91 : vector<16x128xf32>
    %cst_63 = arith.constant 0.000000e+00 : f32
    %93 = vector.broadcast %cst_63 : f32 to vector<16x128xf32>
    %94 = arith.maximumf %92, %93 : vector<16x128xf32>
    %c1_64 = arith.constant 1 : index
    %c0_65 = arith.constant 0 : index
    %c0_66 = arith.constant 0 : index
    %95 = vector.load %arg14[%c1_64, %c0_65, %c0_66] : memref<4x128x128xbf16, #tpu.memory_space<vmem>>, vector<1x128x128xbf16>
    %96 = vector.shape_cast %95 : vector<1x128x128xbf16> to vector<128x128xbf16>
    %97 = arith.truncf %94 : vector<16x128xf32> to vector<16x128xbf16>
    %cst_67 = arith.constant dense<0.000000e+00> : vector<16x128xf32>
    %98 = tpu.matmul %97, %96, %cst_67 {dimension_numbers = #tpu.dot_dimension_numbers<[1], [0], [0], [1], [0, 0, 1, 1], [], []>} : vector<16x128xbf16>, vector<128x128xbf16>, vector<16x128xf32> -> vector<16x128xf32>
    %c1_68 = arith.constant 1 : index
    %c0_69 = arith.constant 0 : index
    %c0_70 = arith.constant 0 : index
    %99 = vector.load %arg15[%c1_68, %c0_69, %c0_70] : memref<4x1x128xf32, #tpu.memory_space<vmem>>, vector<1x1x128xf32>
    %100 = vector.shape_cast %99 : vector<1x1x128xf32> to vector<1x128xf32>
    %101 = vector.broadcast %100 : vector<1x128xf32> to vector<16x128xf32>
    %102 = arith.addf %98, %101 : vector<16x128xf32>
    %cst_71 = arith.constant 0.000000e+00 : f32
    %103 = vector.broadcast %cst_71 : f32 to vector<16x128xf32>
    %104 = arith.maximumf %102, %103 : vector<16x128xf32>
    %c0_72 = arith.constant 0 : index
    %c0_73 = arith.constant 0 : index
    %105 = vector.load %arg2[%c0_72, %c0_73] : memref<40x128xf32, #tpu.memory_space<vmem>>, vector<40x128xf32>
    %c2 = arith.constant 2 : index
    %c0_74 = arith.constant 0 : index
    %c0_75 = arith.constant 0 : index
    %106 = vector.load %arg10[%c2, %c0_74, %c0_75] : memref<4x128x128xbf16, #tpu.memory_space<vmem>>, vector<1x128x128xbf16>
    %107 = vector.shape_cast %106 : vector<1x128x128xbf16> to vector<128x128xbf16>
    %108 = arith.truncf %105 : vector<40x128xf32> to vector<40x128xbf16>
    %cst_76 = arith.constant dense<0.000000e+00> : vector<40x128xf32>
    %109 = tpu.matmul %108, %107, %cst_76 {dimension_numbers = #tpu.dot_dimension_numbers<[1], [0], [0], [1], [0, 0, 1, 1], [], []>} : vector<40x128xbf16>, vector<128x128xbf16>, vector<40x128xf32> -> vector<40x128xf32>
    %c2_77 = arith.constant 2 : index
    %c0_78 = arith.constant 0 : index
    %c0_79 = arith.constant 0 : index
    %110 = vector.load %arg11[%c2_77, %c0_78, %c0_79] : memref<4x1x128xf32, #tpu.memory_space<vmem>>, vector<1x1x128xf32>
    %111 = vector.shape_cast %110 : vector<1x1x128xf32> to vector<1x128xf32>
    %112 = vector.broadcast %111 : vector<1x128xf32> to vector<40x128xf32>
    %113 = arith.addf %109, %112 : vector<40x128xf32>
    %114 = arith.truncf %104 : vector<16x128xf32> to vector<16x128xbf16>
    %cst_80 = arith.constant dense<0.000000e+00> : vector<40x128xf32>
    %115 = tpu.matmul %7, %114, %cst_80 {dimension_numbers = #tpu.dot_dimension_numbers<[1], [0], [0], [1], [0, 0, 1, 1], [], []>} : vector<40x16xbf16>, vector<16x128xbf16>, vector<40x128xf32> -> vector<40x128xf32>
    %116 = arith.addf %115, %113 : vector<40x128xf32>
    %cst_81 = arith.constant 0.000000e+00 : f32
    %117 = vector.broadcast %cst_81 : f32 to vector<40x128xf32>
    %118 = arith.maximumf %116, %117 : vector<40x128xf32>
    %119 = arith.truncf %118 : vector<40x128xf32> to vector<40x128xbf16>
    %cst_82 = arith.constant dense<0.000000e+00> : vector<16x128xf32>
    %120 = tpu.matmul %15, %119, %cst_82 {dimension_numbers = #tpu.dot_dimension_numbers<[1], [0], [0], [1], [0, 0, 1, 1], [], []>} : vector<16x40xbf16>, vector<40x128xbf16>, vector<16x128xf32> -> vector<16x128xf32>
    %c2_83 = arith.constant 2 : index
    %121 = memref.load %arg0[%c2_83] : memref<4xf32, #tpu.memory_space<smem>>
    %cst_84 = arith.constant 1.000000e+00 : f32
    %122 = arith.addf %cst_84, %121 : f32
    %123 = vector.broadcast %122 : f32 to vector<16x128xf32>
    %124 = arith.mulf %123, %104 : vector<16x128xf32>
    %125 = arith.addf %124, %120 : vector<16x128xf32>
    %c2_85 = arith.constant 2 : index
    %c0_86 = arith.constant 0 : index
    %c0_87 = arith.constant 0 : index
    %126 = vector.load %arg12[%c2_85, %c0_86, %c0_87] : memref<4x128x128xbf16, #tpu.memory_space<vmem>>, vector<1x128x128xbf16>
    %127 = vector.shape_cast %126 : vector<1x128x128xbf16> to vector<128x128xbf16>
    %128 = arith.truncf %125 : vector<16x128xf32> to vector<16x128xbf16>
    %cst_88 = arith.constant dense<0.000000e+00> : vector<16x128xf32>
    %129 = tpu.matmul %128, %127, %cst_88 {dimension_numbers = #tpu.dot_dimension_numbers<[1], [0], [0], [1], [0, 0, 1, 1], [], []>} : vector<16x128xbf16>, vector<128x128xbf16>, vector<16x128xf32> -> vector<16x128xf32>
    %c2_89 = arith.constant 2 : index
    %c0_90 = arith.constant 0 : index
    %c0_91 = arith.constant 0 : index
    %130 = vector.load %arg13[%c2_89, %c0_90, %c0_91] : memref<4x1x128xf32, #tpu.memory_space<vmem>>, vector<1x1x128xf32>
    %131 = vector.shape_cast %130 : vector<1x1x128xf32> to vector<1x128xf32>
    %132 = vector.broadcast %131 : vector<1x128xf32> to vector<16x128xf32>
    %133 = arith.addf %129, %132 : vector<16x128xf32>
    %cst_92 = arith.constant 0.000000e+00 : f32
    %134 = vector.broadcast %cst_92 : f32 to vector<16x128xf32>
    %135 = arith.maximumf %133, %134 : vector<16x128xf32>
    %c2_93 = arith.constant 2 : index
    %c0_94 = arith.constant 0 : index
    %c0_95 = arith.constant 0 : index
    %136 = vector.load %arg14[%c2_93, %c0_94, %c0_95] : memref<4x128x128xbf16, #tpu.memory_space<vmem>>, vector<1x128x128xbf16>
    %137 = vector.shape_cast %136 : vector<1x128x128xbf16> to vector<128x128xbf16>
    %138 = arith.truncf %135 : vector<16x128xf32> to vector<16x128xbf16>
    %cst_96 = arith.constant dense<0.000000e+00> : vector<16x128xf32>
    %139 = tpu.matmul %138, %137, %cst_96 {dimension_numbers = #tpu.dot_dimension_numbers<[1], [0], [0], [1], [0, 0, 1, 1], [], []>} : vector<16x128xbf16>, vector<128x128xbf16>, vector<16x128xf32> -> vector<16x128xf32>
    %c2_97 = arith.constant 2 : index
    %c0_98 = arith.constant 0 : index
    %c0_99 = arith.constant 0 : index
    %140 = vector.load %arg15[%c2_97, %c0_98, %c0_99] : memref<4x1x128xf32, #tpu.memory_space<vmem>>, vector<1x1x128xf32>
    %141 = vector.shape_cast %140 : vector<1x1x128xf32> to vector<1x128xf32>
    %142 = vector.broadcast %141 : vector<1x128xf32> to vector<16x128xf32>
    %143 = arith.addf %139, %142 : vector<16x128xf32>
    %cst_100 = arith.constant 0.000000e+00 : f32
    %144 = vector.broadcast %cst_100 : f32 to vector<16x128xf32>
    %145 = arith.maximumf %143, %144 : vector<16x128xf32>
    %c0_101 = arith.constant 0 : index
    %c0_102 = arith.constant 0 : index
    %146 = vector.load %arg2[%c0_101, %c0_102] : memref<40x128xf32, #tpu.memory_space<vmem>>, vector<40x128xf32>
    %c3 = arith.constant 3 : index
    %c0_103 = arith.constant 0 : index
    %c0_104 = arith.constant 0 : index
    %147 = vector.load %arg10[%c3, %c0_103, %c0_104] : memref<4x128x128xbf16, #tpu.memory_space<vmem>>, vector<1x128x128xbf16>
    %148 = vector.shape_cast %147 : vector<1x128x128xbf16> to vector<128x128xbf16>
    %149 = arith.truncf %146 : vector<40x128xf32> to vector<40x128xbf16>
    %cst_105 = arith.constant dense<0.000000e+00> : vector<40x128xf32>
    %150 = tpu.matmul %149, %148, %cst_105 {dimension_numbers = #tpu.dot_dimension_numbers<[1], [0], [0], [1], [0, 0, 1, 1], [], []>} : vector<40x128xbf16>, vector<128x128xbf16>, vector<40x128xf32> -> vector<40x128xf32>
    %c3_106 = arith.constant 3 : index
    %c0_107 = arith.constant 0 : index
    %c0_108 = arith.constant 0 : index
    %151 = vector.load %arg11[%c3_106, %c0_107, %c0_108] : memref<4x1x128xf32, #tpu.memory_space<vmem>>, vector<1x1x128xf32>
    %152 = vector.shape_cast %151 : vector<1x1x128xf32> to vector<1x128xf32>
    %153 = vector.broadcast %152 : vector<1x128xf32> to vector<40x128xf32>
    %154 = arith.addf %150, %153 : vector<40x128xf32>
    %155 = arith.truncf %145 : vector<16x128xf32> to vector<16x128xbf16>
    %cst_109 = arith.constant dense<0.000000e+00> : vector<40x128xf32>
    %156 = tpu.matmul %7, %155, %cst_109 {dimension_numbers = #tpu.dot_dimension_numbers<[1], [0], [0], [1], [0, 0, 1, 1], [], []>} : vector<40x16xbf16>, vector<16x128xbf16>, vector<40x128xf32> -> vector<40x128xf32>
    %157 = arith.addf %156, %154 : vector<40x128xf32>
    %cst_110 = arith.constant 0.000000e+00 : f32
    %158 = vector.broadcast %cst_110 : f32 to vector<40x128xf32>
    %159 = arith.maximumf %157, %158 : vector<40x128xf32>
    %160 = arith.truncf %159 : vector<40x128xf32> to vector<40x128xbf16>
    %cst_111 = arith.constant dense<0.000000e+00> : vector<16x128xf32>
    %161 = tpu.matmul %15, %160, %cst_111 {dimension_numbers = #tpu.dot_dimension_numbers<[1], [0], [0], [1], [0, 0, 1, 1], [], []>} : vector<16x40xbf16>, vector<40x128xbf16>, vector<16x128xf32> -> vector<16x128xf32>
    %c3_112 = arith.constant 3 : index
    %162 = memref.load %arg0[%c3_112] : memref<4xf32, #tpu.memory_space<smem>>
    %cst_113 = arith.constant 1.000000e+00 : f32
    %163 = arith.addf %cst_113, %162 : f32
    %164 = vector.broadcast %163 : f32 to vector<16x128xf32>
    %165 = arith.mulf %164, %145 : vector<16x128xf32>
    %166 = arith.addf %165, %161 : vector<16x128xf32>
    %c3_114 = arith.constant 3 : index
    %c0_115 = arith.constant 0 : index
    %c0_116 = arith.constant 0 : index
    %167 = vector.load %arg12[%c3_114, %c0_115, %c0_116] : memref<4x128x128xbf16, #tpu.memory_space<vmem>>, vector<1x128x128xbf16>
    %168 = vector.shape_cast %167 : vector<1x128x128xbf16> to vector<128x128xbf16>
    %169 = arith.truncf %166 : vector<16x128xf32> to vector<16x128xbf16>
    %cst_117 = arith.constant dense<0.000000e+00> : vector<16x128xf32>
    %170 = tpu.matmul %169, %168, %cst_117 {dimension_numbers = #tpu.dot_dimension_numbers<[1], [0], [0], [1], [0, 0, 1, 1], [], []>} : vector<16x128xbf16>, vector<128x128xbf16>, vector<16x128xf32> -> vector<16x128xf32>
    %c3_118 = arith.constant 3 : index
    %c0_119 = arith.constant 0 : index
    %c0_120 = arith.constant 0 : index
    %171 = vector.load %arg13[%c3_118, %c0_119, %c0_120] : memref<4x1x128xf32, #tpu.memory_space<vmem>>, vector<1x1x128xf32>
    %172 = vector.shape_cast %171 : vector<1x1x128xf32> to vector<1x128xf32>
    %173 = vector.broadcast %172 : vector<1x128xf32> to vector<16x128xf32>
    %174 = arith.addf %170, %173 : vector<16x128xf32>
    %cst_121 = arith.constant 0.000000e+00 : f32
    %175 = vector.broadcast %cst_121 : f32 to vector<16x128xf32>
    %176 = arith.maximumf %174, %175 : vector<16x128xf32>
    %c3_122 = arith.constant 3 : index
    %c0_123 = arith.constant 0 : index
    %c0_124 = arith.constant 0 : index
    %177 = vector.load %arg14[%c3_122, %c0_123, %c0_124] : memref<4x128x128xbf16, #tpu.memory_space<vmem>>, vector<1x128x128xbf16>
    %178 = vector.shape_cast %177 : vector<1x128x128xbf16> to vector<128x128xbf16>
    %179 = arith.truncf %176 : vector<16x128xf32> to vector<16x128xbf16>
    %cst_125 = arith.constant dense<0.000000e+00> : vector<16x128xf32>
    %180 = tpu.matmul %179, %178, %cst_125 {dimension_numbers = #tpu.dot_dimension_numbers<[1], [0], [0], [1], [0, 0, 1, 1], [], []>} : vector<16x128xbf16>, vector<128x128xbf16>, vector<16x128xf32> -> vector<16x128xf32>
    %c3_126 = arith.constant 3 : index
    %c0_127 = arith.constant 0 : index
    %c0_128 = arith.constant 0 : index
    %181 = vector.load %arg15[%c3_126, %c0_127, %c0_128] : memref<4x1x128xf32, #tpu.memory_space<vmem>>, vector<1x1x128xf32>
    %182 = vector.shape_cast %181 : vector<1x1x128xf32> to vector<1x128xf32>
    %183 = vector.broadcast %182 : vector<1x128xf32> to vector<16x128xf32>
    %184 = arith.addf %180, %183 : vector<16x128xf32>
    %c0_129 = arith.constant 0 : index
    %c0_130 = arith.constant 0 : index
    %185 = vector.load %arg16[%c0_129, %c0_130] : memref<128x128xbf16, #tpu.memory_space<vmem>>, vector<128x128xbf16>
    %186 = arith.truncf %184 : vector<16x128xf32> to vector<16x128xbf16>
    %cst_131 = arith.constant dense<0.000000e+00> : vector<16x128xf32>
    %187 = tpu.matmul %186, %185, %cst_131 {dimension_numbers = #tpu.dot_dimension_numbers<[1], [0], [0], [1], [0, 0, 1, 1], [], []>} : vector<16x128xbf16>, vector<128x128xbf16>, vector<16x128xf32> -> vector<16x128xf32>
    %c0_132 = arith.constant 0 : index
    %c0_133 = arith.constant 0 : index
    %188 = vector.load %arg17[%c0_132, %c0_133] : memref<1x128xf32, #tpu.memory_space<vmem>>, vector<1x128xf32>
    %189 = vector.broadcast %188 : vector<1x128xf32> to vector<16x128xf32>
    %190 = arith.addf %187, %189 : vector<16x128xf32>
    %cst_134 = arith.constant 0.000000e+00 : f32
    %191 = vector.broadcast %cst_134 : f32 to vector<16x128xf32>
    %192 = arith.maximumf %190, %191 : vector<16x128xf32>
    %c0_135 = arith.constant 0 : index
    %c0_136 = arith.constant 0 : index
    %193 = vector.load %arg18[%c0_135, %c0_136] : memref<128x128xbf16, #tpu.memory_space<vmem>>, vector<128x128xbf16>
    %194 = arith.truncf %192 : vector<16x128xf32> to vector<16x128xbf16>
    %cst_137 = arith.constant dense<0.000000e+00> : vector<16x128xf32>
    %195 = tpu.matmul %194, %193, %cst_137 {dimension_numbers = #tpu.dot_dimension_numbers<[1], [0], [0], [1], [0, 0, 1, 1], [], []>} : vector<16x128xbf16>, vector<128x128xbf16>, vector<16x128xf32> -> vector<16x128xf32>
    %c0_138 = arith.constant 0 : index
    %c0_139 = arith.constant 0 : index
    %196 = vector.load %arg19[%c0_138, %c0_139] : memref<1x128xf32, #tpu.memory_space<vmem>>, vector<1x128xf32>
    %197 = vector.broadcast %196 : vector<1x128xf32> to vector<16x128xf32>
    %198 = arith.addf %195, %197 : vector<16x128xf32>
    %199 = vector.extract_strided_slice %198 {offsets = [0, 0], sizes = [16, 1], strides = [1, 1]} : vector<16x128xf32> to vector<16x1xf32>
    %200 = tpu.iota {dimensions = array<i32: 1>} : vector<16x2xi32>
    %c0_140 = arith.constant 0 : index
    %c0_141 = arith.constant 0 : index
    %201 = vector.load %arg5[%c0_140, %c0_141] : memref<16x1xi32, #tpu.memory_space<vmem>>, vector<16x1xi32>
    %202 = vector.broadcast %201 : vector<16x1xi32> to vector<16x2xi32>
    %203 = arith.cmpi eq, %200, %202 : vector<16x2xi32>
    %cst_142 = arith.constant -1.000000e+30 : f32
    %204 = vector.shape_cast %199 : vector<16x1xf32> to vector<16x1xf32>
    %205 = vector.broadcast %204 : vector<16x1xf32> to vector<16x2xf32>
    %206 = vector.broadcast %cst_142 : f32 to vector<16x2xf32>
    %207 = arith.select %203, %205, %206 : vector<16x2xi1>, vector<16x2xf32>
    %cst_143 = arith.constant dense<0xFF800000> : vector<2xf32>
    %208 = vector.multi_reduction <maximumf>, %207, %cst_143 [0] : vector<16x2xf32> to vector<2xf32>
    %209 = vector.shape_cast %208 : vector<2xf32> to vector<1x2xf32>
    %210 = vector.broadcast %209 : vector<1x2xf32> to vector<16x2xf32>
    %211 = arith.subf %207, %210 : vector<16x2xf32>
    %212 = math.exp %211 : vector<16x2xf32>
    %cst_144 = arith.constant 0.000000e+00 : f32
    %213 = vector.broadcast %cst_144 : f32 to vector<16x2xf32>
    %214 = arith.select %203, %212, %213 : vector<16x2xi1>, vector<16x2xf32>
    %cst_145 = arith.constant dense<0.000000e+00> : vector<2xf32>
    %215 = vector.multi_reduction <add>, %214, %cst_145 [0] : vector<16x2xf32> to vector<2xf32>
    %216 = vector.shape_cast %215 : vector<2xf32> to vector<1x2xf32>
    %217 = vector.broadcast %216 : vector<1x2xf32> to vector<16x2xf32>
    %218 = arith.divf %214, %217 : vector<16x2xf32>
    %cst_146 = arith.constant dense<0.000000e+00> : vector<16xf32>
    %219 = vector.multi_reduction <add>, %218, %cst_146 [1] : vector<16x2xf32> to vector<16xf32>
    %220 = vector.shape_cast %219 : vector<16xf32> to vector<16x1xf32>
    %221 = tpu.iota {dimensions = array<i32: 0>} : vector<2x16xi32>
    %c0_147 = arith.constant 0 : index
    %c0_148 = arith.constant 0 : index
    %222 = vector.load %arg6[%c0_147, %c0_148] : memref<1x16xi32, #tpu.memory_space<vmem>>, vector<1x16xi32>
    %223 = vector.broadcast %222 : vector<1x16xi32> to vector<2x16xi32>
    %224 = arith.cmpi eq, %221, %223 : vector<2x16xi32>
    %cst_149 = arith.constant 1.000000e+00 : f32
    %cst_150 = arith.constant 0.000000e+00 : f32
    %225 = vector.broadcast %cst_149 : f32 to vector<2x16xf32>
    %226 = vector.broadcast %cst_150 : f32 to vector<2x16xf32>
    %227 = arith.select %224, %225, %226 : vector<2x16xi1>, vector<2x16xf32>
    %228 = arith.truncf %227 : vector<2x16xf32> to vector<2x16xbf16>
    %229 = vector.broadcast %220 : vector<16x1xf32> to vector<16x128xf32>
    %230 = arith.mulf %229, %184 : vector<16x128xf32>
    %231 = arith.truncf %230 : vector<16x128xf32> to vector<16x128xbf16>
    %cst_151 = arith.constant dense<0.000000e+00> : vector<2x128xf32>
    %232 = tpu.matmul %228, %231, %cst_151 {dimension_numbers = #tpu.dot_dimension_numbers<[1], [0], [0], [1], [0, 0, 1, 1], [], []>} : vector<2x16xbf16>, vector<16x128xbf16>, vector<2x128xf32> -> vector<2x128xf32>
    %c0_152 = arith.constant 0 : index
    %c0_153 = arith.constant 0 : index
    %233 = vector.load %arg20[%c0_152, %c0_153] : memref<128x128xbf16, #tpu.memory_space<vmem>>, vector<128x128xbf16>
    %234 = arith.truncf %232 : vector<2x128xf32> to vector<2x128xbf16>
    %cst_154 = arith.constant dense<0.000000e+00> : vector<2x128xf32>
    %235 = tpu.matmul %234, %233, %cst_154 {dimension_numbers = #tpu.dot_dimension_numbers<[1], [0], [0], [1], [0, 0, 1, 1], [], []>} : vector<2x128xbf16>, vector<128x128xbf16>, vector<2x128xf32> -> vector<2x128xf32>
    %c0_155 = arith.constant 0 : index
    %c0_156 = arith.constant 0 : index
    %236 = vector.load %arg7[%c0_155, %c0_156] : memref<2x128xf32, #tpu.memory_space<vmem>>, vector<2x128xf32>
    %c0_157 = arith.constant 0 : index
    %c0_158 = arith.constant 0 : index
    %237 = vector.load %arg21[%c0_157, %c0_158] : memref<128x128xbf16, #tpu.memory_space<vmem>>, vector<128x128xbf16>
    %238 = arith.truncf %236 : vector<2x128xf32> to vector<2x128xbf16>
    %cst_159 = arith.constant dense<0.000000e+00> : vector<2x128xf32>
    %239 = tpu.matmul %238, %237, %cst_159 {dimension_numbers = #tpu.dot_dimension_numbers<[1], [0], [0], [1], [0, 0, 1, 1], [], []>} : vector<2x128xbf16>, vector<128x128xbf16>, vector<2x128xf32> -> vector<2x128xf32>
    %240 = arith.addf %235, %239 : vector<2x128xf32>
    %c0_160 = arith.constant 0 : index
    %c0_161 = arith.constant 0 : index
    %241 = vector.load %arg22[%c0_160, %c0_161] : memref<1x128xf32, #tpu.memory_space<vmem>>, vector<1x128xf32>
    %242 = vector.broadcast %241 : vector<1x128xf32> to vector<2x128xf32>
    %243 = arith.addf %240, %242 : vector<2x128xf32>
    %cst_162 = arith.constant 0.000000e+00 : f32
    %244 = vector.broadcast %cst_162 : f32 to vector<2x128xf32>
    %245 = arith.maximumf %243, %244 : vector<2x128xf32>
    %c0_163 = arith.constant 0 : index
    %c0_164 = arith.constant 0 : index
    %246 = vector.load %arg23[%c0_163, %c0_164] : memref<128x128xbf16, #tpu.memory_space<vmem>>, vector<128x128xbf16>
    %247 = arith.truncf %245 : vector<2x128xf32> to vector<2x128xbf16>
    %cst_165 = arith.constant dense<0.000000e+00> : vector<2x128xf32>
    %248 = tpu.matmul %247, %246, %cst_165 {dimension_numbers = #tpu.dot_dimension_numbers<[1], [0], [0], [1], [0, 0, 1, 1], [], []>} : vector<2x128xbf16>, vector<128x128xbf16>, vector<2x128xf32> -> vector<2x128xf32>
    %c0_166 = arith.constant 0 : index
    %c0_167 = arith.constant 0 : index
    %249 = vector.load %arg24[%c0_166, %c0_167] : memref<1x128xf32, #tpu.memory_space<vmem>>, vector<1x128xf32>
    %250 = vector.broadcast %249 : vector<1x128xf32> to vector<2x128xf32>
    %251 = arith.addf %248, %250 : vector<2x128xf32>
    %cst_168 = arith.constant 0.000000e+00 : f32
    %252 = vector.broadcast %cst_168 : f32 to vector<2x128xf32>
    %253 = arith.maximumf %251, %252 : vector<2x128xf32>
    %c0_169 = arith.constant 0 : index
    %c0_170 = arith.constant 0 : index
    %254 = vector.load %arg25[%c0_169, %c0_170] : memref<128x128xbf16, #tpu.memory_space<vmem>>, vector<128x128xbf16>
    %255 = arith.truncf %253 : vector<2x128xf32> to vector<2x128xbf16>
    %cst_171 = arith.constant dense<0.000000e+00> : vector<2x128xf32>
    %256 = tpu.matmul %255, %254, %cst_171 {dimension_numbers = #tpu.dot_dimension_numbers<[1], [0], [0], [1], [0, 0, 1, 1], [], []>} : vector<2x128xbf16>, vector<128x128xbf16>, vector<2x128xf32> -> vector<2x128xf32>
    %c0_172 = arith.constant 0 : index
    %c0_173 = arith.constant 0 : index
    %257 = vector.load %arg26[%c0_172, %c0_173] : memref<1x128xf32, #tpu.memory_space<vmem>>, vector<1x128xf32>
    %258 = vector.broadcast %257 : vector<1x128xf32> to vector<2x128xf32>
    %259 = arith.addf %256, %258 : vector<2x128xf32>
    %c0_174 = arith.constant 0 : index
    %c0_175 = arith.constant 0 : index
    %260 = vector.load %arg27[%c0_174, %c0_175] : memref<2x128xf32, #tpu.memory_space<vmem>>, vector<2x128xf32>
    tpu.vector_store %arg27[%c0_174, %c0_175], %259 {strides = array<i32>} : memref<2x128xf32, #tpu.memory_space<vmem>>, vector<2x128xf32>,
    return
  }
}

</mosaic_0001>

<bundles_post_ra>
// kernel: gnn_graph_forward.1
= control target key start
LH: loop header
LB: loop body
LE: loop exit
PB: predicated region body
PF: predicated region fallthrough
CT: control target
= control target key end

     0   :  { %s3980_s0 = inlined_call_operand.vmem [shape: f32[4], index: 0, kind: input, shape index: {}]   ;;  %s3981_s1 = inlined_call_operand.vmem [shape: f32[16,128], index: 1, kind: input, shape index: {}]   ;;  %s3982_s2 = inlined_call_operand.vmem [shape: f32[40,128], index: 2, kind: input, shape index: {}]   ;;  %s3983_s3 = inlined_call_operand.vmem [shape: s32[40,1], index: 3, kind: input, shape index: {}]   ;;  %s3984_s4 = inlined_call_operand.vmem [shape: s32[1,40], index: 4, kind: input, shape index: {}]   ;;  %s3985_s5 = inlined_call_operand.vmem [shape: s32[16,1], index: 5, kind: input, shape index: {}]   ;;  %s3986_s6 = inlined_call_operand.vmem [shape: s32[1,16], index: 6, kind: input, shape index: {}]   ;;  %s3987_s7 = inlined_call_operand.vmem [shape: f32[2,128], index: 7, kind: input, shape index: {}]   ;;  %s3988_s8 = inlined_call_operand.vmem [shape: bf16[128,128], index: 8, kind: input, shape index: {}]   ;;  %s3989_s9 = inlined_call_operand.vmem [shape: f32[1,128], index: 9, kind: input, shape index: {}]   ;;  %s3990_s10 = inlined_call_operand.vmem [shape: bf16[4,128,128], index: 10, kind: input, shape index: {}]   ;;  %s3991_s11 = inlined_call_operand.vmem [shape: f32[4,1,128], index: 11, kind: input, shape index: {}]   ;;  %s3992_s12 = inlined_call_operand.vmem [shape: bf16[4,128,128], index: 12, kind: input, shape index: {}]   ;;  %s3993_s13 = inlined_call_operand.vmem [shape: f32[4,1,128], index: 13, kind: input, shape index: {}]   ;;  %s3994_s14 = inlined_call_operand.vmem [shape: bf16[4,128,128], index: 14, kind: input, shape index: {}]   ;;  %s3995_s15 = inlined_call_operand.vmem [shape: f32[4,1,128], index: 15, kind: input, shape index: {}]   ;;  %s3996_s16 = inlined_call_operand.vmem [shape: bf16[128,128], index: 16, kind: input, shape index: {}]   ;;  %s3997_s17 = inlined_call_operand.vmem [shape: f32[1,128], index: 17, kind: input, shape index: {}]   ;;  %s3998_s18 = inlined_call_operand.vmem [shape: bf16[128,128], index: 18, kind: input, shape index: {}]   ;;  %s3999_s19 = inlined_call_operand.vmem [shape: f32[1,128], index: 19, kind: input, shape index: {}]   ;;  %s4000_s20 = inlined_call_operand.vmem [shape: bf16[128,128], index: 20, kind: input, shape index: {}]   ;;  %s4001_s21 = inlined_call_operand.vmem [shape: bf16[128,128], index: 21, kind: input, shape index: {}]   ;;  %s4002_s22 = inlined_call_operand.vmem [shape: f32[1,128], index: 22, kind: input, shape index: {}]   ;;  %s4003_s23 = inlined_call_operand.vmem [shape: bf16[128,128], index: 23, kind: input, shape index: {}]   ;;  %s4004_s24 = inlined_call_operand.vmem [shape: f32[1,128], index: 24, kind: input, shape index: {}]   ;;  %s4005_s25 = inlined_call_operand.vmem [shape: bf16[128,128], index: 25, kind: input, shape index: {}]   ;;  %s4006_s26 = inlined_call_operand.vmem [shape: f32[1,128], index: 26, kind: input, shape index: {}]   ;;  %s4007_s27 = inlined_call_operand.vmem [shape: f32[2,128], index: 27, kind: output, shape index: {}]  }
   0x1   :  { %4015 = sst [smem:[#allocation5_spill]] %s3980_s0 }
   0x2   :  { %4016 = sst [smem:[#allocation6_spill]] %s3981_s1 }
   0x3   :  { %4017 = sst [smem:[#allocation7_spill]] %s3982_s2 }
   0x4   :  { %4018 = sst [smem:[#allocation8_spill]] %s3983_s3 }
   0x5   :  { %4019 = sst [smem:[#allocation9_spill]] %s3984_s4 }
   0x6   :  { %4020 = sst [smem:[#allocation10_spill]] %s3985_s5 }
   0x7   :  { %4021 = sst [smem:[#allocation11_spill]] %s3986_s6 }
   0x8   :  { %4022 = sst [smem:[#allocation12_spill]] %s3987_s7 }
   0x9   :  { %4023 = sst [smem:[#allocation13_spill]] %s3988_s8 }
   0xa   :  { %4024 = sst [smem:[#allocation14_spill]] %s3989_s9 }
   0xb   :  { %4025 = sst [smem:[#allocation15_spill]] %s3990_s10 }
   0xc   :  { %4026 = sst [smem:[#allocation16_spill]] %s3991_s11 }
   0xd   :  { %32 = vsyncpa [#allocation3], 0  ;;  %s4027_s8 = sld [smem:[#allocation5_spill]]  ;;  %s3113_s9 = smov [#allocation2]  }
  0x13   :  { %s38_s30 = sshll.u32 %s4027_s8, 4  ;;  %s39_s30 = int_to_ptr.vmem [resolvable:$true] %s38_s30 }
  0x14   :  { %41 = dma.vmem_to_smem %s39_s30, 16, %s3113_s9, [#allocation3]  }
  0x15   :  { %3111 = dma.done.wait [#allocation3], 16  }
  0x16   :  { %3112 = vsyncadd [#allocation3], 4294967280 }
  0x17   :  { %98 = sfence }
  0x18   :  { %s4028_s0 = sld [smem:[#allocation13_spill]]  ;;  %v3114_v1 = vmov 0   ;;  %v100_v34 = vlaneseq  ;;  %v3115_v44 = vmov 0.0   ;;  %vm330_vm2 = vcmask 130048  }
  0x19   :  { %3070 = vset.pattern.permute.xlu0 %v3114_v1  ;;  %3071 = vset.pattern.permute.xlu1 %v3114_v1  ;;  %s4029_s11 = sld [smem:[#allocation8_spill]]  ;;  %vm375_vm6 = vcmask 1043456   ;;  %vm371_vm9 = vcmask 326656   ;;  %vm1727_vm11 = vcmask 15360  }
  0x1a   :  { %3072 = vset.pattern.permute.xlu2 %v3114_v1  ;;  %s4030_s28 = sld [smem:[#allocation15_spill]]  ;;  %v3352_v36 = vand.u32 127, %v100_v34 }
  0x1b   :  { %s4031_s9 = sld [smem:[#allocation10_spill]] }
  0x1c   :  { %s4032_s5 = sld [smem:[#allocation6_spill]] }
  0x1d   :  { %s4033_s29 = sld [smem:[#allocation7_spill]] }
  0x1e   :  { %v2922_v0 = vld [vmem:[%s4028_s0 + $0x38] sm:$0xff]  ;;  %v2921_v2 = vld [vmem:[%s4028_s0 + $0x30] sm:$0xff]  ;;  %v2920_v5 = vld [vmem:[%s4028_s0 + $0x28] sm:$0xff]  ;;  %s4034_s8 = sld [smem:[#allocation14_spill]] }
  0x1f   :  { %216 = vmatpush.bf16.msra.mxu0 %v2922_v0  ;;  %v102_v3 = vld [vmem:[%s4029_s11] sm:$0xff]  ;;  %v104_v4 = vld [vmem:[%s4029_s11 + $0x10] sm:$0xff]  ;;  %v103_v8 = vld [vmem:[%s4029_s11 + $0x8] sm:$0xff]  ;;  %s4036_s6 = sld [smem:[#allocation9_spill]] }
  0x20   :  { %108 = vperm.xlu0 %3070, %v102_v3   ;;  %114 = vperm.xlu1 %3071, %v104_v4   ;;  %v106_v6 = vld [vmem:[%s4029_s11 + $0x20] sm:$0xff]  ;;  %v2930_v7 = vld [vmem:[%s4030_s28 + $0x38] sm:$0xff]  ;;  %v2929_v9 = vld [vmem:[%s4030_s28 + $0x30] sm:$0xff]  ;;  %s2319_s3 = sld [smem:[#allocation2 + $0x1]] }
  0x21   :  { %120 = vperm.xlu2 %3072, %v106_v6   ;;  %306 = vmatpush.bf16.msra.mxu1 %v2930_v7  ;;  %v2919_v10 = vld [vmem:[%s4028_s0 + $0x20] sm:$0xff]  ;;  %v105_v11 = vld [vmem:[%s4029_s11 + $0x18] sm:$0xff]  ;;  %v1706_v14 = vld [vmem:[%s4031_s9 + $0x8] sm:$0xff]  ;;  %s393_s11 = sld [smem:[#allocation2]] }
  0x22   :  { %v1705_v12 = vld [vmem:[%s4031_s9] sm:$0xff]  ;;  %v2918_v13 = vld [vmem:[%s4028_s0 + $0x18] sm:$0xff]  ;;  %v2917_v15 = vld [vmem:[%s4028_s0 + $0x10] sm:$0xff]  ;;  %s2471_s30 = sld [smem:[#allocation2 + $0x2]] }
  0x23   :  { %217 = vmatpush.bf16.msra.mxu0 %v2921_v2  ;;  %v2916_v16 = vld [vmem:[%s4028_s0 + $0x8] sm:$0xff]  ;;  %v2915_v17 = vld [vmem:[%s4028_s0] sm:$0xff]  ;;  %v2926_v23 = vld [vmem:[%s4030_s28 + $0x18] sm:$0xff]  ;;  %s4037_s9 = sld [smem:[#allocation11_spill]] }
  0x24   :  { %v145_v18 = vld [vmem:[%s4032_s5] sm:$0xff]  ;;  %v146_v19 = vld [vmem:[%s4032_s5 + $0x8] sm:$0xff]  ;;  %v2925_v24 = vld [vmem:[%s4030_s28 + $0x10] sm:$0xff] }
  0x25   :  { %307 = vmatpush.bf16.msra.mxu1 %v2929_v9  ;;  %v163_v20 = vpack.c.bf16 %v146_v19, %v145_v18  ;;  %v2928_v21 = vld [vmem:[%s4030_s28 + $0x28] sm:$0xff]  ;;  %v2927_v22 = vld [vmem:[%s4030_s28 + $0x20] sm:$0xff]  ;;  %v232_v30 = vld [vmem:[%s4033_s29 + $0x10] sm:$0xff] }
  0x26   :  { %v2924_v25 = vld [vmem:[%s4030_s28 + $0x8] sm:$0xff]  ;;  %v2923_v26 = vld [vmem:[%s4030_s28] sm:$0xff]  ;;  %v233_v31 = vld [vmem:[%s4033_s29 + $0x18] sm:$0xff]  ;;  %s713_s7 = sadd.f32 1.0, %s2319_s3 }
  0x27   :  { %218 = vmatpush.bf16.msra.mxu0 %v2920_v5  ;;  %v230_v27 = vld [vmem:[%s4033_s29] sm:$0xff]  ;;  %v231_v28 = vld [vmem:[%s4033_s29 + $0x8] sm:$0xff]  ;;  %v3349_v32 = vpack.c.bf16 %v233_v31, %v232_v30  ;;  %v2938_v31 = vld [vmem:[%s3992_s12 + $0x38] sm:$0xff] }
  0x28   :  { %111 = vperm.xlu0 %3070, %v103_v8   ;;  %117 = vperm.xlu1 %3071, %v105_v11   ;;  %v3340_v29 = vpack.c.bf16 %v231_v28, %v230_v27  ;;  %v3073_v37 = vld [vmem:[%s4034_s8] ss:$0 sm:$0xff]  ;;  %s1036_s5 = sadd.f32 1.0, %s2471_s30 }
  0x29   :  { %1708 = vperm.xlu2 %3072, %v1705_v12   ;;  %308 = vmatpush.bf16.msra.mxu1 %v2928_v21  ;;  %v234_v38 = vld [vmem:[%s4033_s29 + $0x20] sm:$0xff]  ;;  %s4035_s29 = sld [smem:[#allocation16_spill]] }
  0x2a   :  { %v3362_v41 = vpack.c.bf16 %v234_v38, %v234_v38  ;;  %v2934_v38 = vld [vmem:[%s3992_s12 + $0x18] sm:$0xff] }
  0x2b   :  { %219 = vmatpush.bf16.msra.mxu0 %v2919_v10 }
  0x2d   :  { %309 = vmatpush.bf16.msra.mxu1 %v2927_v22  ;;  %v3075_v22 = vld [vmem:[%s4036_s6] ss:$0 sm:$0xff]  ;;  %s394_s6 = sadd.f32 1.0, %s393_s11 }
  0x2f   :  { %220 = vmatpush.bf16.msra.mxu0 %v2918_v13  ;;  %v3074_v63 = vld [vmem:[%s4035_s29] ss:$0 sm:$0xff] }
  0x30   :  { %1711 = vperm.xlu0 %3070, %v1706_v14  }
  0x31   :  { %310 = vmatpush.bf16.msra.mxu1 %v2926_v23 }
  0x33   :  { %221 = vmatpush.bf16.msra.mxu0 %v2917_v15 }
  0x35   :  { %311 = vmatpush.bf16.msra.mxu1 %v2925_v24 }
  0x37   :  { %222 = vmatpush.bf16.msra.mxu0 %v2916_v16  ;;  %v3394_v16 = vshrl.u32 %v100_v34, 7  ;;  %v2937_v34 = vld [vmem:[%s3992_s12 + $0x30] sm:$0xff] }
  0x39   :  { %312 = vmatpush.bf16.msra.mxu1 %v2924_v25  ;;  %v137_v21 = vadd.s32 8, %v3394_v16  ;;  %vm140_vm7 = vcmp.eq.s32.totalorder %v3394_v16, %v3075_v22 }
  0x3a   :  { %v142_v28 = vsel %vm140_vm7, 1.0, %v3115_v44 }
  0x3b   :  { %223 = vmatpush.bf16.msra.mxu0 %v2915_v17  ;;  %vm141_vm8 = vcmp.eq.s32.totalorder %v137_v21, %v3075_v22 }
  0x3c   :  { %v143_v30 = vsel %vm141_vm8, 1.0, %v3115_v44 }
  0x3d   :  { %313 = vmatpush.bf16.msra.mxu1 %v2923_v26 }
  0x3e   :  { %224 = vmatmul.bf16.vlgmr.msra.gmra.mxu0 %v163_v20 }
  0x40   :  { %314 = vmatmul.bf16.vlgmr.msra.gmra.mxu1 %v3340_v29 }
  0x50   :  { %319 = vmatmul.bf16.gmra.mxu1 %v3349_v32 }
  0x60   :  { %324 = vmatmul.bf16.gmra.mxu1 %v3362_v41 }
  0x7b   :  { %v121_v54 = vpop.permute.xlu2 %120 }
  0x7c   :  { %vm126_vm5 = vcmp.eq.s32.totalorder %v3352_v36, %v121_v54 }
  0x7d   :  { %v131_v55 = vsel %vm126_vm5, 1.0, %v3115_v44 }
  0x7e   :  { %v3387_v56 = vpack.c.bf16 %v131_v55, %v131_v55 }
  0x92   :  { %v109_v33 = vpop.permute.xlu0 %108  ;;  %v115_v47 = vpop.permute.xlu1 %114 }
  0x93   :  { %vm122_vm0 = vcmp.eq.s32.totalorder %v3352_v36, %v109_v33  ;;  %vm124_vm3 = vcmp.eq.s32.totalorder %v3352_v36, %v115_v47  ;;  %v3407_v33 = vpack.c.bf16 %v143_v30, %v142_v28  ;;  %v2945_v47 = vld [vmem:[%s3994_s14 + $0x30] sm:$0xff] }
  0x94   :  { %v127_v45 = vsel %vm122_vm0, 1.0, %v3115_v44  ;;  %v129_v51 = vsel %vm124_vm3, 1.0, %v3115_v44 }
  0x9a   :  { %v112_v39 = vpop.permute.xlu0 %111  ;;  %v118_v50 = vpop.permute.xlu1 %117 }
  0x9b   :  { %vm123_vm1 = vcmp.eq.s32.totalorder %v3352_v36, %v112_v39  ;;  %vm125_vm4 = vcmp.eq.s32.totalorder %v3352_v36, %v118_v50  ;;  %v2933_v39 = vld [vmem:[%s3992_s12 + $0x10] sm:$0xff]  ;;  %v2943_v50 = vld [vmem:[%s3994_s14 + $0x20] sm:$0xff] }
  0x9c   :  { %v128_v46 = vsel %vm123_vm1, 1.0, %v3115_v44  ;;  %v130_v52 = vsel %vm125_vm4, 1.0, %v3115_v44 }
  0x9d   :  { %v3373_v49 = vpack.c.bf16 %v128_v46, %v127_v45  ;;  %v3381_v53 = vpack.c.bf16 %v130_v52, %v129_v51  ;;  %v2931_v45 = vld [vmem:[%s3992_s12] sm:$0xff]  ;;  %v2946_v46 = vld [vmem:[%s3994_s14 + $0x38] sm:$0xff]  ;;  %v395_v52 = vstv %s394_s6 }
  0xbb   :  { %v225_v35 = vpop.f32.mrf.mxu0 }
  0xbc   :  { %v3364_v42 = vadd.f32 %v3073_v37, %v225_v35  ;;  %v2936_v35 = vld [vmem:[%s3992_s12 + $0x28] sm:$0xff] }
  0xbd   :  { %v315_v57 = vpop.f32.mrf.mxu1 }
  0xbe   :  { %v316_v1 = vadd.f32 %v3074_v63, %v315_v57  ;;  %v396_v54 = vmul.f32 %v395_v52, %v3364_v42 }
  0xc3   :  { %v227_v40 = vpop.f32.mrf.mxu0 }
  0xc4   :  { %v3366_v43 = vadd.f32 %v3073_v37, %v227_v40  ;;  %v2935_v37 = vld [vmem:[%s3992_s12 + $0x20] sm:$0xff]  ;;  %v2932_v40 = vld [vmem:[%s3992_s12 + $0x8] sm:$0xff] }
  0xc5   :  { %v317_v58 = vpop.f32.mrf.mxu1 }
  0xc6   :  { %v329_v48 = vpack.c.bf16 %v3366_v43, %v3364_v42  ;;  %v318_v2 = vadd.f32 %v3074_v63, %v317_v58  ;;  %v397_v55 = vmul.f32 %v395_v52, %v3366_v43  ;;  %v2940_v42 = vld [vmem:[%s3994_s14 + $0x8] sm:$0xff]  ;;  %v2939_v43 = vld [vmem:[%s3994_s14] sm:$0xff] }
  0xc8   :  { %347 = vmatpush.bf16.msra.mxu2 %v329_v48  ;;  %v2944_v48 = vld [vmem:[%s3994_s14 + $0x28] sm:$0xff] }
  0xcb   :  { %2198 = vmatmul.msk.bf16.vlgmr.msra.gmra.mxu2 %vm330_vm2, %v3373_v49 }
  0xcc   :  { %554 = vmatpush.bf16.msrb.mxu2 %v2946_v46 }
  0xcd   :  { %v320_v59 = vpop.f32.mrf.mxu1 }
  0xce   :  { %v321_v12 = vadd.f32 %v3074_v63, %v320_v59 }
  0xd0   :  { %555 = vmatpush.bf16.msrb.mxu2 %v2945_v47 }
  0xd4   :  { %556 = vmatpush.bf16.msrb.mxu2 %v2944_v48 }
  0xd5   :  { %v322_v60 = vpop.f32.mrf.mxu1 }
  0xd6   :  { %v323_v13 = vadd.f32 %v3074_v63, %v322_v60 }
  0xd8   :  { %557 = vmatpush.bf16.msrb.mxu2 %v2943_v50  ;;  %v2962_v50 = vld [vmem:[%s3992_s12 + $0x78] sm:$0xff] }
  0xd9   :  { %790 = vmatpush.bf16.msrb.mxu1 %v2962_v50 }
  0xdb   :  { %2199 = vmatmul.msk.bf16.gmra.mxu2 %vm330_vm2, %v3381_v53 }
  0xdd   :  { %v325_v61 = vpop.f32.mrf.mxu1 }
  0xde   :  { %v326_v11 = vadd.f32 %v3074_v63, %v325_v61  ;;  %v2942_v61 = vld [vmem:[%s3994_s14 + $0x18] sm:$0xff] }
  0xdf   :  { %558 = vmatpush.bf16.msrb.mxu2 %v2942_v61  ;;  %v2954_v63 = vld [vmem:[%s4030_s28 + $0x78] sm:$0xff] }
  0xe0   :  { %640 = vmatpush.bf16.msrb.mxu0 %v2954_v63 }
  0xe5   :  { %v327_v62 = vpop.f32.mrf.mxu1 }
  0xe6   :  { %v2941_v62 = vld [vmem:[%s3994_s14 + $0x10] sm:$0xff] }
  0xe7   :  { %559 = vmatpush.bf16.msrb.mxu2 %v2941_v62  ;;  %v2958_v62 = vld [vmem:[%s3992_s12 + $0x58] sm:$0xff] }
  0xeb   :  { %2200 = vmatmul.msk.bf16.gmra.mxu2 %vm330_vm2, %v3387_v56 }
  0xec   :  { %560 = vmatpush.bf16.msrb.mxu2 %v2940_v42 }
  0xf0   :  { %561 = vmatpush.bf16.msrb.mxu2 %v2939_v43 }
 0x14e   :  { %v349_v0 = vpop.f32.mrf.mxu2 }
 0x14f   :  { %v350_v3 = vadd.f32 %v349_v0, %v316_v1  ;;  %v2953_v0 = vld [vmem:[%s4030_s28 + $0x70] sm:$0xff]  ;;  %v2952_v1 = vld [vmem:[%s4030_s28 + $0x68] sm:$0xff] }
 0x150   :  { %641 = vmatpush.bf16.msrb.mxu0 %v2953_v0 }
 0x151   :  { %v363_v6 = vmax.f32 %v350_v3, 0.0  ;;  %v2950_v3 = vld [vmem:[%s4030_s28 + $0x58] sm:$0xff] }
 0x154   :  { %642 = vmatpush.bf16.msrb.mxu0 %v2952_v1 }
 0x156   :  { %v351_v4 = vpop.f32.mrf.mxu2 }
 0x157   :  { %v352_v5 = vadd.f32 %v351_v4, %v318_v2  ;;  %v2951_v2 = vld [vmem:[%s4030_s28 + $0x60] sm:$0xff] }
 0x158   :  { %643 = vmatpush.bf16.msrb.mxu0 %v2951_v2 }
 0x159   :  { %v364_v7 = vmax.f32 %v352_v5, 0.0  ;;  %v3076_v5 = vld [vmem:[%s3993_s13] ss:$0 sm:$0xff] }
 0x15b   :  { %v368_v8 = vpack.c.bf16 %v364_v7, %v363_v6 }
 0x15c   :  { %644 = vmatpush.bf16.msrb.mxu0 %v2950_v3 }
 0x15e   :  { %v354_v9 = vpop.f32.mrf.mxu2 }
 0x15f   :  { %v355_v19 = vadd.f32 %v354_v9, %v321_v12  ;;  %v2949_v12 = vld [vmem:[%s4030_s28 + $0x50] sm:$0xff] }
 0x160   :  { %645 = vmatpush.bf16.msrb.mxu0 %v2949_v12  ;;  %v2967_v12 = vld [vmem:[%s3994_s14 + $0x60] sm:$0xff] }
 0x161   :  { %v365_v25 = vmax.f32 %v355_v19, 0.0 }
 0x166   :  { %v356_v10 = vpop.f32.mrf.mxu2 }
 0x167   :  { %v357_v17 = vadd.f32 %v356_v10, %v323_v13  ;;  %v2948_v13 = vld [vmem:[%s4030_s28 + $0x48] sm:$0xff] }
 0x168   :  { %646 = vmatpush.bf16.msrb.mxu0 %v2948_v13 }
 0x169   :  { %v366_v23 = vmax.f32 %v357_v17, 0.0  ;;  %v3077_v17 = vld [vmem:[%s3995_s15] ss:$0 sm:$0xff] }
 0x16b   :  { %v369_v27 = vpack.c.bf16 %v366_v23, %v365_v25 }
 0x16e   :  { %v359_v14 = vpop.f32.mrf.mxu2 }
 0x16f   :  { %v360_v15 = vadd.f32 %v359_v14, %v326_v11  ;;  %v2947_v14 = vld [vmem:[%s4030_s28 + $0x40] sm:$0xff] }
 0x170   :  { %647 = vmatpush.bf16.msrb.mxu0 %v2947_v14  ;;  %v714_v14 = vstv %s713_s7 }
 0x171   :  { %v367_v18 = vmax.f32 %v360_v15, 0.0 }
 0x173   :  { %v370_v20 = vpack.c.bf16 %v367_v18, %v367_v18  ;;  %648 = vmatmul.bf16.vlgmr.msrb.gmra.mxu0 %v3340_v29 }
 0x175   :  { %v377_v24 = vsel %vm375_vm6, %v370_v20, 0 }
 0x176   :  { %v361_v26 = vpop.f32.mrf.mxu2  ;;  %384 = vmatpush.bf16.msra.mxu3 %v377_v24 }
 0x17a   :  { %385 = vmatpush.bf16.msra.mxu3 %v369_v27 }
 0x17e   :  { %386 = vmatpush.bf16.msra.mxu3 %v368_v8 }
 0x181   :  { %2201 = vmatmul.msk.bf16.vlgmr.msra.gmra.mxu3 %vm371_vm9, %v3407_v33 }
 0x182   :  { %469 = vmatpush.bf16.msrb.mxu3 %v2938_v31  ;;  %v3078_v31 = vld [vmem:[%s4035_s29 + $0x1] ss:$0 sm:$0xff] }
 0x183   :  { %653 = vmatmul.bf16.gmra.mxu0 %v3349_v32 }
 0x186   :  { %470 = vmatpush.bf16.msrb.mxu3 %v2937_v34 }
 0x18a   :  { %471 = vmatpush.bf16.msrb.mxu3 %v2936_v35 }
 0x18e   :  { %472 = vmatpush.bf16.msrb.mxu3 %v2935_v37 }
 0x192   :  { %473 = vmatpush.bf16.msrb.mxu3 %v2934_v38 }
 0x193   :  { %658 = vmatmul.bf16.gmra.mxu0 %v3362_v41 }
 0x196   :  { %474 = vmatpush.bf16.msrb.mxu3 %v2933_v39 }
 0x19a   :  { %475 = vmatpush.bf16.msrb.mxu3 %v2932_v40 }
 0x19e   :  { %476 = vmatpush.bf16.msrb.mxu3 %v2931_v45 }
 0x1f0   :  { %v649_v24 = vpop.f32.mrf.mxu0 }
 0x1f1   :  { %v650_v35 = vadd.f32 %v3078_v31, %v649_v24 }
 0x1f8   :  { %v651_v25 = vpop.f32.mrf.mxu0 }
 0x1f9   :  { %v652_v37 = vadd.f32 %v3078_v31, %v651_v25 }
 0x200   :  { %v654_v26 = vpop.f32.mrf.mxu0 }
 0x204   :  { %v388_v51 = vpop.f32.mrf.mxu3 }
 0x205   :  { %v398_v58 = vadd.f32 %v396_v54, %v388_v51  ;;  %v2961_v51 = vld [vmem:[%s3992_s12 + $0x70] sm:$0xff]  ;;  %v2960_v54 = vld [vmem:[%s3992_s12 + $0x68] sm:$0xff] }
 0x206   :  { %791 = vmatpush.bf16.msrb.mxu1 %v2961_v51 }
 0x208   :  { %v656_v27 = vpop.f32.mrf.mxu0 }
 0x20a   :  { %792 = vmatpush.bf16.msrb.mxu1 %v2960_v54 }
 0x20c   :  { %v390_v57 = vpop.f32.mrf.mxu3 }
 0x20d   :  { %v399_v59 = vadd.f32 %v397_v55, %v390_v57  ;;  %v2959_v57 = vld [vmem:[%s3992_s12 + $0x60] sm:$0xff] }
 0x20e   :  { %793 = vmatpush.bf16.msrb.mxu1 %v2959_v57 }
 0x20f   :  { %v416_v60 = vpack.c.bf16 %v399_v59, %v398_v58  ;;  %v655_v58 = vadd.f32 %v3078_v31, %v654_v26  ;;  %v657_v59 = vadd.f32 %v3078_v31, %v656_v27  ;;  %v2966_v26 = vld [vmem:[%s3994_s14 + $0x58] sm:$0xff]  ;;  %v2965_v27 = vld [vmem:[%s3994_s14 + $0x50] sm:$0xff] }
 0x210   :  { %v659_v28 = vpop.f32.mrf.mxu0 }
 0x211   :  { %477 = vmatmul.bf16.vlgmr.msrb.gmra.mxu3 %v416_v60  ;;  %v660_v55 = vadd.f32 %v3078_v31, %v659_v28  ;;  %v2976_v28 = vld [vmem:[%s4030_s28 + $0xa8] sm:$0xff]  ;;  %v2974_v31 = vld [vmem:[%s4030_s28 + $0x98] sm:$0xff] }
 0x212   :  { %794 = vmatpush.bf16.msrb.mxu1 %v2958_v62 }
 0x218   :  { %v661_v30 = vpop.f32.mrf.mxu0 }
 0x219   :  { %v2975_v30 = vld [vmem:[%s4030_s28 + $0xa0] sm:$0xff] }
 0x294   :  { %v478_v4 = vpop.f32.mrf.mxu3 }
 0x295   :  { %v479_v6 = vadd.f32 %v3076_v5, %v478_v4 }
 0x297   :  { %v483_v9 = vmax.f32 %v479_v6, 0.0  ;;  %v2957_v6 = vld [vmem:[%s3992_s12 + $0x50] sm:$0xff] }
 0x298   :  { %795 = vmatpush.bf16.msrb.mxu1 %v2957_v6 }
 0x29c   :  { %v480_v7 = vpop.f32.mrf.mxu3 }
 0x29d   :  { %v481_v8 = vadd.f32 %v3076_v5, %v480_v7  ;;  %v2956_v7 = vld [vmem:[%s3992_s12 + $0x48] sm:$0xff] }
 0x29e   :  { %796 = vmatpush.bf16.msrb.mxu1 %v2956_v7  ;;  %v2984_v7 = vld [vmem:[%s3992_s12 + $0xa8] sm:$0xff] }
 0x29f   :  { %v484_v10 = vmax.f32 %v481_v8, 0.0  ;;  %v2955_v8 = vld [vmem:[%s3992_s12 + $0x40] sm:$0xff] }
 0x2a1   :  { %v501_v11 = vpack.c.bf16 %v484_v10, %v483_v9  ;;  %v2970_v9 = vld [vmem:[%s3994_s14 + $0x78] sm:$0xff]  ;;  %v2969_v10 = vld [vmem:[%s3994_s14 + $0x70] sm:$0xff] }
 0x2a2   :  { %797 = vmatpush.bf16.msrb.mxu1 %v2955_v8  ;;  %v3081_v8 = vld [vmem:[%s4035_s29 + $0x2] ss:$0 sm:$0xff] }
 0x2a3   :  { %562 = vmatmul.bf16.vlgmr.msrb.gmra.mxu2 %v501_v11  ;;  %v2968_v11 = vld [vmem:[%s3994_s14 + $0x68] sm:$0xff] }
 0x326   :  { %v563_v15 = vpop.f32.mrf.mxu2 }
 0x327   :  { %v3490_v18 = vadd.f32 %v3077_v17, %v563_v15 }
 0x329   :  { %v568_v21 = vmax.f32 %v3490_v18, 0.0  ;;  %v2964_v18 = vld [vmem:[%s3994_s14 + $0x48] sm:$0xff] }
 0x32b   :  { %v715_v15 = vmul.f32 %v714_v14, %v568_v21 }
 0x32e   :  { %v565_v19 = vpop.f32.mrf.mxu2 }
 0x32f   :  { %v3492_v20 = vadd.f32 %v3077_v17, %v565_v19 }
 0x331   :  { %v569_v22 = vmax.f32 %v3492_v20, 0.0  ;;  %v2963_v20 = vld [vmem:[%s3994_s14 + $0x40] sm:$0xff] }
 0x333   :  { %v663_v23 = vpack.c.bf16 %v569_v22, %v568_v21  ;;  %v716_v17 = vmul.f32 %v714_v14, %v569_v22  ;;  %v2978_v21 = vld [vmem:[%s4030_s28 + $0xb8] sm:$0xff]  ;;  %v2977_v22 = vld [vmem:[%s4030_s28 + $0xb0] sm:$0xff] }
 0x335   :  { %671 = vmatpush.bf16.msra.mxu3 %v663_v23 }
 0x338   :  { %2315 = vmatmul.msk.bf16.vlgmr.msra.gmra.mxu3 %vm330_vm2, %v3373_v49 }
 0x339   :  { %963 = vmatpush.bf16.msrb.mxu3 %v2978_v21 }
 0x33d   :  { %964 = vmatpush.bf16.msrb.mxu3 %v2977_v22 }
 0x341   :  { %965 = vmatpush.bf16.msrb.mxu3 %v2976_v28 }
 0x345   :  { %966 = vmatpush.bf16.msrb.mxu3 %v2975_v30 }
 0x348   :  { %2316 = vmatmul.msk.bf16.gmra.mxu3 %vm330_vm2, %v3381_v53 }
 0x349   :  { %967 = vmatpush.bf16.msrb.mxu3 %v2974_v31 }
 0x358   :  { %2317 = vmatmul.msk.bf16.gmra.mxu3 %vm330_vm2, %v3387_v56 }
 0x3bb   :  { %v673_v34 = vpop.f32.mrf.mxu3 }
 0x3bc   :  { %v674_v38 = vadd.f32 %v673_v34, %v650_v35  ;;  %v2973_v35 = vld [vmem:[%s4030_s28 + $0x90] sm:$0xff] }
 0x3bd   :  { %968 = vmatpush.bf16.msrb.mxu3 %v2973_v35 }
 0x3be   :  { %v687_v45 = vmax.f32 %v674_v38, 0.0  ;;  %v2972_v38 = vld [vmem:[%s4030_s28 + $0x88] sm:$0xff] }
 0x3c1   :  { %969 = vmatpush.bf16.msrb.mxu3 %v2972_v38  ;;  %v2980_v38 = vld [vmem:[%s3992_s12 + $0x88] sm:$0xff] }
 0x3c3   :  { %v675_v39 = vpop.f32.mrf.mxu3 }
 0x3c4   :  { %v676_v40 = vadd.f32 %v675_v39, %v652_v37  ;;  %v3079_v37 = vld [vmem:[%s3993_s13 + $0x1] ss:$0 sm:$0xff] }
 0x3c6   :  { %v688_v46 = vmax.f32 %v676_v40, 0.0 }
 0x3c8   :  { %v692_v47 = vpack.c.bf16 %v688_v46, %v687_v45  ;;  %v2971_v46 = vld [vmem:[%s4030_s28 + $0x80] sm:$0xff] }
 0x3c9   :  { %970 = vmatpush.bf16.msrb.mxu3 %v2971_v46  ;;  %v2992_v46 = vld [vmem:[%s3994_s14 + $0xa8] sm:$0xff] }
 0x3cb   :  { %v678_v48 = vpop.f32.mrf.mxu3 }
 0x3cc   :  { %v679_v63 = vadd.f32 %v678_v48, %v655_v58  ;;  %971 = vmatmul.bf16.vlgmr.msrb.gmra.mxu3 %v3340_v29 }
 0x3ce   :  { %v689_v3 = vmax.f32 %v679_v63, 0.0 }
 0x3d3   :  { %v680_v52 = vpop.f32.mrf.mxu3 }
 0x3d4   :  { %v681_v42 = vadd.f32 %v680_v52, %v657_v59  ;;  %v3080_v52 = vld [vmem:[%s3995_s15 + $0x1] ss:$0 sm:$0xff] }
 0x3d6   :  { %v690_v1 = vmax.f32 %v681_v42, 0.0 }
 0x3d8   :  { %v693_v5 = vpack.c.bf16 %v690_v1, %v689_v3 }
 0x3db   :  { %v683_v60 = vpop.f32.mrf.mxu3 }
 0x3dc   :  { %v684_v61 = vadd.f32 %v683_v60, %v660_v55  ;;  %976 = vmatmul.bf16.gmra.mxu3 %v3349_v32 }
 0x3de   :  { %v691_v43 = vmax.f32 %v684_v61, 0.0 }
 0x3e0   :  { %v694_v0 = vpack.c.bf16 %v691_v43, %v691_v43 }
 0x3e2   :  { %v696_v2 = vsel %vm375_vm6, %v694_v0, 0 }
 0x3e3   :  { %v685_v4 = vpop.f32.mrf.mxu3  ;;  %703 = vmatpush.bf16.msra.mxu2 %v696_v2 }
 0x3e4   :  { %v2986_v4 = vld [vmem:[%s3992_s12 + $0xb8] sm:$0xff] }
 0x3e7   :  { %704 = vmatpush.bf16.msra.mxu2 %v693_v5  ;;  %v2985_v5 = vld [vmem:[%s3992_s12 + $0xb0] sm:$0xff] }
 0x3eb   :  { %705 = vmatpush.bf16.msra.mxu2 %v692_v47 }
 0x3ec   :  { %981 = vmatmul.bf16.gmra.mxu3 %v3362_v41 }
 0x3ee   :  { %2318 = vmatmul.msk.bf16.vlgmr.msra.gmra.mxu2 %vm371_vm9, %v3407_v33 }
 0x3ef   :  { %877 = vmatpush.bf16.msrb.mxu2 %v2970_v9 }
 0x3f3   :  { %878 = vmatpush.bf16.msrb.mxu2 %v2969_v10  ;;  %v2983_v10 = vld [vmem:[%s3992_s12 + $0xa0] sm:$0xff] }
 0x3f7   :  { %879 = vmatpush.bf16.msrb.mxu2 %v2968_v11 }
 0x3fb   :  { %880 = vmatpush.bf16.msrb.mxu2 %v2967_v12 }
 0x3ff   :  { %881 = vmatpush.bf16.msrb.mxu2 %v2966_v26 }
 0x403   :  { %882 = vmatpush.bf16.msrb.mxu2 %v2965_v27 }
 0x407   :  { %883 = vmatpush.bf16.msrb.mxu2 %v2964_v18 }
 0x40b   :  { %884 = vmatpush.bf16.msrb.mxu2 %v2963_v20 }
 0x40f   :  { %1113 = vmatpush.bf16.msra.mxu2 %v2986_v4 }
 0x413   :  { %1114 = vmatpush.bf16.msra.mxu2 %v2985_v5 }
 0x417   :  { %1115 = vmatpush.bf16.msra.mxu2 %v2984_v7 }
 0x41b   :  { %1116 = vmatpush.bf16.msra.mxu2 %v2983_v10  ;;  %v2997_v10 = vld [vmem:[%s4030_s28 + $0xd0] sm:$0xff] }
 0x44f   :  { %v972_v61 = vpop.f32.mrf.mxu3 }
 0x457   :  { %v974_v62 = vpop.f32.mrf.mxu3 }
 0x45f   :  { %v977_v42 = vpop.f32.mrf.mxu3 }
 0x460   :  { %v978_v11 = vadd.f32 %v3081_v8, %v977_v42  ;;  %v2990_v42 = vld [vmem:[%s3994_s14 + $0x98] sm:$0xff] }
 0x467   :  { %v979_v43 = vpop.f32.mrf.mxu3 }
 0x468   :  { %v980_v12 = vadd.f32 %v3081_v8, %v979_v43  ;;  %v2989_v43 = vld [vmem:[%s3994_s14 + $0x90] sm:$0xff] }
 0x46f   :  { %v982_v63 = vpop.f32.mrf.mxu3 }
 0x470   :  { %v983_v9 = vadd.f32 %v3081_v8, %v982_v63  ;;  %v3000_v63 = vld [vmem:[%s4030_s28 + $0xe8] sm:$0xff] }
 0x471   :  { %v707_v13 = vpop.f32.mrf.mxu2 }
 0x472   :  { %v717_v23 = vadd.f32 %v715_v15, %v707_v13  ;;  %v2982_v15 = vld [vmem:[%s3992_s12 + $0x98] sm:$0xff] }
 0x473   :  { %1117 = vmatpush.bf16.msra.mxu2 %v2982_v15 }
 0x477   :  { %v984_v0 = vpop.f32.mrf.mxu3 }
 0x478   :  { %v2999_v0 = vld [vmem:[%s4030_s28 + $0xe0] sm:$0xff] }
 0x479   :  { %v709_v19 = vpop.f32.mrf.mxu2 }
 0x47a   :  { %v718_v24 = vadd.f32 %v716_v17, %v709_v19 }
 0x47c   :  { %v736_v25 = vpack.c.bf16 %v718_v24, %v717_v23  ;;  %v973_v23 = vadd.f32 %v3081_v8, %v972_v61  ;;  %v975_v24 = vadd.f32 %v3081_v8, %v974_v62 }
 0x47e   :  { %798 = vmatmul.bf16.vlgmr.msrb.gmra.mxu1 %v736_v25 }
 0x4fb   :  { %v799_v34 = vpop.f32.mrf.mxu1 }
 0x4fc   :  { %v800_v39 = vadd.f32 %v3079_v37, %v799_v34 }
 0x4fe   :  { %v804_v47 = vmax.f32 %v800_v39, 0.0  ;;  %v2979_v39 = vld [vmem:[%s3992_s12 + $0x80] sm:$0xff] }
 0x503   :  { %v801_v40 = vpop.f32.mrf.mxu1 }
 0x504   :  { %v802_v45 = vadd.f32 %v3079_v37, %v801_v40  ;;  %v2981_v37 = vld [vmem:[%s3992_s12 + $0x90] sm:$0xff]  ;;  %v2994_v40 = vld [vmem:[%s3994_s14 + $0xb8] sm:$0xff] }
 0x505   :  { %1118 = vmatpush.bf16.msra.mxu2 %v2981_v37  ;;  %v3010_v37 = vld [vmem:[%s3992_s12 + $0xf8] sm:$0xff] }
 0x506   :  { %v805_v48 = vmax.f32 %v802_v45, 0.0  ;;  %v2993_v45 = vld [vmem:[%s3994_s14 + $0xb0] sm:$0xff] }
 0x508   :  { %v823_v50 = vpack.c.bf16 %v805_v48, %v804_v47  ;;  %v2991_v47 = vld [vmem:[%s3994_s14 + $0xa0] sm:$0xff] }
 0x509   :  { %1119 = vmatpush.bf16.msra.mxu2 %v2980_v38  ;;  %v3009_v38 = vld [vmem:[%s3992_s12 + $0xf0] sm:$0xff] }
 0x50a   :  { %885 = vmatmul.bf16.vlgmr.msrb.gmra.mxu2 %v823_v50  ;;  %v1037_v50 = vstv %s1036_s5 }
 0x50d   :  { %1120 = vmatpush.bf16.msra.mxu2 %v2979_v39 }
 0x58d   :  { %v886_v51 = vpop.f32.mrf.mxu2 }
 0x58e   :  { %v3598_v54 = vadd.f32 %v3080_v52, %v886_v51 }
 0x590   :  { %v891_v58 = vmax.f32 %v3598_v54, 0.0  ;;  %v2988_v54 = vld [vmem:[%s3994_s14 + $0x88] sm:$0xff] }
 0x592   :  { %v1038_v51 = vmul.f32 %v1037_v50, %v891_v58 }
 0x595   :  { %v888_v55 = vpop.f32.mrf.mxu2 }
 0x596   :  { %v3600_v57 = vadd.f32 %v3080_v52, %v888_v55 }
 0x598   :  { %v892_v59 = vmax.f32 %v3600_v57, 0.0  ;;  %v2987_v57 = vld [vmem:[%s3994_s14 + $0x80] sm:$0xff] }
 0x59a   :  { %v986_v60 = vpack.c.bf16 %v892_v59, %v891_v58  ;;  %v1039_v52 = vmul.f32 %v1037_v50, %v892_v59  ;;  %v3002_v58 = vld [vmem:[%s4030_s28 + $0xf8] sm:$0xff]  ;;  %v3001_v59 = vld [vmem:[%s4030_s28 + $0xf0] sm:$0xff] }
 0x59c   :  { %994 = vmatpush.bf16.msra.mxu1 %v986_v60 }
 0x59f   :  { %2467 = vmatmul.msk.bf16.vlgmr.msra.gmra.mxu1 %vm330_vm2, %v3373_v49 }
 0x5a0   :  { %1286 = vmatpush.bf16.msrb.mxu1 %v3002_v58 }
 0x5a4   :  { %1287 = vmatpush.bf16.msrb.mxu1 %v3001_v59  ;;  %v3005_v59 = vld [vmem:[%s3992_s12 + $0xd0] sm:$0xff] }
 0x5a8   :  { %1288 = vmatpush.bf16.msrb.mxu1 %v3000_v63  ;;  %v3004_v63 = vld [vmem:[%s3992_s12 + $0xc8] sm:$0xff] }
 0x5ac   :  { %1289 = vmatpush.bf16.msrb.mxu1 %v2999_v0  ;;  %v3003_v0 = vld [vmem:[%s3992_s12 + $0xc0] sm:$0xff] }
 0x5af   :  { %2468 = vmatmul.msk.bf16.gmra.mxu1 %vm330_vm2, %v3381_v53 }
 0x5bf   :  { %2469 = vmatmul.msk.bf16.gmra.mxu1 %vm330_vm2, %v3387_v56 }
 0x61c   :  { %v996_v1 = vpop.f32.mrf.mxu1 }
 0x61d   :  { %v997_v21 = vadd.f32 %v996_v1, %v973_v23  ;;  %v2998_v1 = vld [vmem:[%s4030_s28 + $0xd8] sm:$0xff] }
 0x61e   :  { %1290 = vmatpush.bf16.msrb.mxu1 %v2998_v1  ;;  %v3018_v1 = vld [vmem:[%s3994_s14 + $0xf8] sm:$0xff] }
 0x61f   :  { %v1010_v34 = vmax.f32 %v997_v21, 0.0 }
 0x622   :  { %1291 = vmatpush.bf16.msrb.mxu1 %v2997_v10 }
 0x624   :  { %v998_v2 = vpop.f32.mrf.mxu1 }
 0x625   :  { %v999_v27 = vadd.f32 %v998_v2, %v975_v24 }
 0x627   :  { %v1011_v30 = vmax.f32 %v999_v27, 0.0 }
 0x629   :  { %v1015_v35 = vpack.c.bf16 %v1011_v30, %v1010_v34 }
 0x62c   :  { %v1001_v3 = vpop.f32.mrf.mxu1 }
 0x62d   :  { %v1002_v25 = vadd.f32 %v1001_v3, %v978_v11  ;;  %v3082_v3 = vld [vmem:[%s3993_s13 + $0x2] ss:$0 sm:$0xff]  ;;  %v2996_v11 = vld [vmem:[%s4030_s28 + $0xc8] sm:$0xff] }
 0x62e   :  { %1292 = vmatpush.bf16.msrb.mxu1 %v2996_v11 }
 0x62f   :  { %v1012_v22 = vmax.f32 %v1002_v25, 0.0 }
 0x634   :  { %v1003_v6 = vpop.f32.mrf.mxu1 }
 0x635   :  { %v1004_v17 = vadd.f32 %v1003_v6, %v980_v12  ;;  %v2995_v12 = vld [vmem:[%s4030_s28 + $0xc0] sm:$0xff] }
 0x636   :  { %1293 = vmatpush.bf16.msrb.mxu1 %v2995_v12  ;;  %v3014_v12 = vld [vmem:[%s3994_s14 + $0xd8] sm:$0xff] }
 0x637   :  { %v1013_v18 = vmax.f32 %v1004_v17, 0.0 }
 0x639   :  { %v1016_v31 = vpack.c.bf16 %v1013_v18, %v1012_v22  ;;  %1294 = vmatmul.bf16.vlgmr.msrb.gmra.mxu1 %v3340_v29 }
 0x63c   :  { %v1006_v13 = vpop.f32.mrf.mxu1 }
 0x63d   :  { %v1007_v14 = vadd.f32 %v1006_v13, %v983_v9 }
 0x63f   :  { %v1014_v19 = vmax.f32 %v1007_v14, 0.0  ;;  %v3083_v14 = vld [vmem:[%s3995_s15 + $0x2] ss:$0 sm:$0xff] }
 0x641   :  { %v1017_v26 = vpack.c.bf16 %v1014_v19, %v1014_v19 }
 0x643   :  { %v1019_v20 = vsel %vm375_vm6, %v1017_v26, 0 }
 0x644   :  { %v1008_v28 = vpop.f32.mrf.mxu1  ;;  %1026 = vmatpush.bf16.msra.mxu0 %v1019_v20 }
 0x648   :  { %1027 = vmatpush.bf16.msra.mxu0 %v1016_v31 }
 0x649   :  { %1299 = vmatmul.bf16.gmra.mxu1 %v3349_v32 }
 0x64c   :  { %1028 = vmatpush.bf16.msra.mxu0 %v1015_v35 }
 0x64f   :  { %2470 = vmatmul.msk.bf16.vlgmr.msra.gmra.mxu0 %vm371_vm9, %v3407_v33 }
 0x650   :  { %1200 = vmatpush.bf16.msrb.mxu0 %v2994_v40  ;;  %v3008_v40 = vld [vmem:[%s3992_s12 + $0xe8] sm:$0xff] }
 0x654   :  { %1201 = vmatpush.bf16.msrb.mxu0 %v2993_v45 }
 0x658   :  { %1202 = vmatpush.bf16.msrb.mxu0 %v2992_v46  ;;  %v3007_v46 = vld [vmem:[%s3992_s12 + $0xe0] sm:$0xff] }
 0x659   :  { %1304 = vmatmul.bf16.gmra.mxu1 %v3362_v41  ;;  %v3084_v41 = vld [vmem:[%s4035_s29 + $0x3] ss:$0 sm:$0xff] }
 0x65c   :  { %1203 = vmatpush.bf16.msrb.mxu0 %v2991_v47 }
 0x660   :  { %1204 = vmatpush.bf16.msrb.mxu0 %v2990_v42 }
 0x664   :  { %1205 = vmatpush.bf16.msrb.mxu0 %v2989_v43 }
 0x668   :  { %1206 = vmatpush.bf16.msrb.mxu0 %v2988_v54 }
 0x66c   :  { %1207 = vmatpush.bf16.msrb.mxu0 %v2987_v57 }
 0x670   :  { %1436 = vmatpush.bf16.msra.mxu0 %v3010_v37 }
 0x674   :  { %1437 = vmatpush.bf16.msra.mxu0 %v3009_v38 }
 0x678   :  { %1438 = vmatpush.bf16.msra.mxu0 %v3008_v40 }
 0x67c   :  { %1439 = vmatpush.bf16.msra.mxu0 %v3007_v46  ;;  %v3029_v46 = vld [vmem:[%s3998_s18 + $0x10] sm:$0xff] }
 0x6b6   :  { %v1295_v32 = vpop.f32.mrf.mxu1 }
 0x6b7   :  { %v1296_v22 = vadd.f32 %v3084_v41, %v1295_v32 }
 0x6be   :  { %v1297_v25 = vpop.f32.mrf.mxu1 }
 0x6bf   :  { %v1298_v28 = vadd.f32 %v3084_v41, %v1297_v25  ;;  %v3085_v25 = vld [vmem:[%s3993_s13 + $0x3] ss:$0 sm:$0xff] }
 0x6c6   :  { %v1300_v26 = vpop.f32.mrf.mxu1 }
 0x6c7   :  { %v1301_v47 = vadd.f32 %v3084_v41, %v1300_v26 }
 0x6cc   :  { %v1030_v48 = vpop.f32.mrf.mxu0 }
 0x6cd   :  { %v1040_v60 = vadd.f32 %v1038_v51, %v1030_v48 }
 0x6ce   :  { %v1302_v27 = vpop.f32.mrf.mxu1 }
 0x6cf   :  { %v1303_v48 = vadd.f32 %v3084_v41, %v1302_v27 }
 0x6d4   :  { %v1032_v55 = vpop.f32.mrf.mxu0 }
 0x6d5   :  { %v1041_v61 = vadd.f32 %v1039_v52, %v1032_v55  ;;  %v3006_v52 = vld [vmem:[%s3992_s12 + $0xd8] sm:$0xff]  ;;  %s2623_s12 = sld [smem:[#allocation2 + $0x3]] }
 0x6d6   :  { %v1305_v18 = vpop.f32.mrf.mxu1  ;;  %1440 = vmatpush.bf16.msra.mxu0 %v3006_v52 }
 0x6d7   :  { %v1059_v62 = vpack.c.bf16 %v1041_v61, %v1040_v60  ;;  %v1306_v45 = vadd.f32 %v3084_v41, %v1305_v18 }
 0x6d9   :  { %1121 = vmatmul.bf16.vlgmr.msra.gmra.mxu2 %v1059_v62 }
 0x6da   :  { %1441 = vmatpush.bf16.msra.mxu0 %v3005_v59 }
 0x6db   :  { %s1359_s30 = sadd.f32 1.0, %s2623_s12 }
 0x6de   :  { %v1307_v20 = vpop.f32.mrf.mxu1  ;;  %1442 = vmatpush.bf16.msra.mxu0 %v3004_v63  ;;  %v1709_v63 = vpop.permute.xlu2 %1708 }
 0x6df   :  { %vm1713_vm12 = vcmp.eq.s32.totalorder %v3352_v36, %v1709_v63 }
 0x6e2   :  { %1443 = vmatpush.bf16.msra.mxu0 %v3003_v0  ;;  %v1712_v0 = vpop.permute.xlu0 %1711 }
 0x6e3   :  { %vm1714_vm10 = vcmp.eq.s32.totalorder %v3352_v36, %v1712_v0 }
 0x75c   :  { %v1122_v2 = vpop.f32.mrf.mxu2 }
 0x75d   :  { %v1123_v4 = vadd.f32 %v3082_v3, %v1122_v2  ;;  %v3016_v2 = vld [vmem:[%s3994_s14 + $0xe8] sm:$0xff] }
 0x75f   :  { %v1127_v7 = vmax.f32 %v1123_v4, 0.0 }
 0x764   :  { %v1124_v5 = vpop.f32.mrf.mxu2 }
 0x765   :  { %v1125_v6 = vadd.f32 %v3082_v3, %v1124_v5  ;;  %v3015_v3 = vld [vmem:[%s3994_s14 + $0xe0] sm:$0xff]  ;;  %v1360_v5 = vstv %s1359_s30 }
 0x767   :  { %v1128_v8 = vmax.f32 %v1125_v6, 0.0 }
 0x769   :  { %v1146_v9 = vpack.c.bf16 %v1128_v8, %v1127_v7 }
 0x76b   :  { %1208 = vmatmul.bf16.vlgmr.msrb.gmra.mxu0 %v1146_v9 }
 0x7e8   :  { %v1209_v13 = vpop.f32.mrf.mxu0 }
 0x7e9   :  { %v3704_v15 = vadd.f32 %v3083_v14, %v1209_v13  ;;  %v3013_v13 = vld [vmem:[%s3994_s14 + $0xd0] sm:$0xff] }
 0x7eb   :  { %v1214_v23 = vmax.f32 %v3704_v15, 0.0  ;;  %v3011_v15 = vld [vmem:[%s3994_s14 + $0xc0] sm:$0xff] }
 0x7ed   :  { %v1361_v6 = vmul.f32 %v1360_v5, %v1214_v23 }
 0x7f0   :  { %v1211_v17 = vpop.f32.mrf.mxu0 }
 0x7f1   :  { %v3706_v19 = vadd.f32 %v3083_v14, %v1211_v17  ;;  %v3012_v14 = vld [vmem:[%s3994_s14 + $0xc8] sm:$0xff]  ;;  %v3026_v17 = vld [vmem:[%s3996_s16 + $0x38] sm:$0xff] }
 0x7f2   :  { %1606 = vmatpush.bf16.msra.mxu1 %v3026_v17 }
 0x7f3   :  { %v1215_v24 = vmax.f32 %v3706_v19, 0.0  ;;  %v3025_v19 = vld [vmem:[%s3996_s16 + $0x30] sm:$0xff] }
 0x7f5   :  { %v1309_v29 = vpack.c.bf16 %v1215_v24, %v1214_v23  ;;  %v1362_v7 = vmul.f32 %v1360_v5, %v1215_v24  ;;  %v3024_v23 = vld [vmem:[%s3996_s16 + $0x28] sm:$0xff]  ;;  %v3023_v24 = vld [vmem:[%s3996_s16 + $0x20] sm:$0xff] }
 0x7f6   :  { %1607 = vmatpush.bf16.msra.mxu1 %v3025_v19 }
 0x7f7   :  { %1317 = vmatpush.bf16.msrb.mxu2 %v1309_v29  ;;  %v3022_v29 = vld [vmem:[%s3996_s16 + $0x18] sm:$0xff] }
 0x7fa   :  { %2619 = vmatmul.msk.bf16.vlgmr.msrb.gmra.mxu2 %vm330_vm2, %v3373_v49  ;;  %1608 = vmatpush.bf16.msra.mxu1 %v3024_v23 }
 0x7fe   :  { %1609 = vmatpush.bf16.msra.mxu1 %v3023_v24 }
 0x802   :  { %1610 = vmatpush.bf16.msra.mxu1 %v3022_v29 }
 0x80a   :  { %2620 = vmatmul.msk.bf16.gmra.mxu2 %vm330_vm2, %v3381_v53 }
 0x81a   :  { %2621 = vmatmul.msk.bf16.gmra.mxu2 %vm330_vm2, %v3387_v56 }
 0x87d   :  { %v1319_v21 = vpop.f32.mrf.mxu2 }
 0x87e   :  { %v1320_v49 = vadd.f32 %v1319_v21, %v1296_v22  ;;  %v3021_v22 = vld [vmem:[%s3996_s16 + $0x10] sm:$0xff] }
 0x87f   :  { %1611 = vmatpush.bf16.msra.mxu1 %v3021_v22 }
 0x880   :  { %v1333_v53 = vmax.f32 %v1320_v49, 0.0  ;;  %v3019_v49 = vld [vmem:[%s3996_s16] sm:$0xff] }
 0x885   :  { %v1321_v30 = vpop.f32.mrf.mxu2 }
 0x886   :  { %v1322_v31 = vadd.f32 %v1321_v30, %v1298_v28  ;;  %v3020_v28 = vld [vmem:[%s3996_s16 + $0x8] sm:$0xff]  ;;  %v3034_v30 = vld [vmem:[%s3998_s18 + $0x38] sm:$0xff] }
 0x887   :  { %1612 = vmatpush.bf16.msra.mxu1 %v3020_v28  ;;  %1691 = vmatpush.bf16.msra.mxu2 %v3034_v30 }
 0x888   :  { %v1334_v34 = vmax.f32 %v1322_v31, 0.0  ;;  %v3033_v31 = vld [vmem:[%s3998_s18 + $0x30] sm:$0xff] }
 0x88a   :  { %v1338_v35 = vpack.c.bf16 %v1334_v34, %v1333_v53  ;;  %v3032_v53 = vld [vmem:[%s3998_s18 + $0x28] sm:$0xff]  ;;  %v3031_v34 = vld [vmem:[%s3998_s18 + $0x20] sm:$0xff] }
 0x88b   :  { %1613 = vmatpush.bf16.msra.mxu1 %v3019_v49  ;;  %1692 = vmatpush.bf16.msra.mxu2 %v3033_v31 }
 0x88d   :  { %v1324_v56 = vpop.f32.mrf.mxu2 }
 0x88e   :  { %v1325_v61 = vadd.f32 %v1324_v56, %v1301_v47  ;;  %v3086_v56 = vld [vmem:[%s3995_s15 + $0x3] ss:$0 sm:$0xff]  ;;  %v3028_v47 = vld [vmem:[%s3998_s18 + $0x8] sm:$0xff] }
 0x88f   :  { %1693 = vmatpush.bf16.msra.mxu2 %v3032_v53 }
 0x890   :  { %v1335_v54 = vmax.f32 %v1325_v61, 0.0 }
 0x893   :  { %1694 = vmatpush.bf16.msra.mxu2 %v3031_v34 }
 0x895   :  { %v1326_v39 = vpop.f32.mrf.mxu2 }
 0x896   :  { %v1327_v55 = vadd.f32 %v1326_v39, %v1303_v48  ;;  %v3027_v48 = vld [vmem:[%s3998_s18] sm:$0xff] }
 0x898   :  { %v1336_v42 = vmax.f32 %v1327_v55, 0.0 }
 0x89a   :  { %v1339_v58 = vpack.c.bf16 %v1336_v42, %v1335_v54 }
 0x89d   :  { %v1329_v50 = vpop.f32.mrf.mxu2 }
 0x89e   :  { %v1330_v51 = vadd.f32 %v1329_v50, %v1306_v45  ;;  %v3030_v45 = vld [vmem:[%s3998_s18 + $0x18] sm:$0xff] }
 0x89f   :  { %1695 = vmatpush.bf16.msra.mxu2 %v3030_v45 }
 0x8a0   :  { %v1337_v60 = vmax.f32 %v1330_v51, 0.0  ;;  %v3087_v51 = vld [vmem:[%s3997_s17] ss:$0 sm:$0xff]  ;;  %s4038_s17 = sld [smem:[#allocation12_spill]] }
 0x8a2   :  { %v1340_v62 = vpack.c.bf16 %v1337_v60, %v1337_v60 }
 0x8a3   :  { %1696 = vmatpush.bf16.msra.mxu2 %v3029_v46 }
 0x8a4   :  { %v1342_v43 = vsel %vm375_vm6, %v1340_v62, 0 }
 0x8a5   :  { %v1331_v57 = vpop.f32.mrf.mxu2  ;;  %1349 = vmatpush.bf16.msra.mxu3 %v1342_v43  ;;  %v3088_v43 = vld [vmem:[%s3999_s19] ss:$0 sm:$0xff] }
 0x8a6   :  { %v1817_v63 = vld [vmem:[%s4038_s17] sm:$0x3] }
 0x8a7   :  { %1697 = vmatpush.bf16.msra.mxu2 %v3028_v47 }
 0x8a9   :  { %1350 = vmatpush.bf16.msra.mxu3 %v1339_v58 }
 0x8ab   :  { %1698 = vmatpush.bf16.msra.mxu2 %v3027_v48  ;;  %v3050_v48 = vld [vmem:[%s4001_s21 + $0x38] sm:$0xff] }
 0x8ad   :  { %1351 = vmatpush.bf16.msra.mxu3 %v1338_v35 }
 0x8b0   :  { %2622 = vmatmul.msk.bf16.vlgmr.msra.gmra.mxu3 %vm371_vm9, %v3407_v33  ;;  %v3017_v33 = vld [vmem:[%s3994_s14 + $0xf0] sm:$0xff] }
 0x8b1   :  { %1523 = vmatpush.bf16.msrb.mxu3 %v3018_v1 }
 0x8b5   :  { %1524 = vmatpush.bf16.msrb.mxu3 %v3017_v33 }
 0x8b9   :  { %1525 = vmatpush.bf16.msrb.mxu3 %v3016_v2 }
 0x8bd   :  { %1526 = vmatpush.bf16.msrb.mxu3 %v3015_v3 }
 0x8c1   :  { %1527 = vmatpush.bf16.msrb.mxu3 %v3014_v12 }
 0x8c5   :  { %1528 = vmatpush.bf16.msrb.mxu3 %v3013_v13 }
 0x8c9   :  { %1529 = vmatpush.bf16.msrb.mxu3 %v3012_v14 }
 0x8cd   :  { %1530 = vmatpush.bf16.msrb.mxu3 %v3011_v15 }
 0x8d1   :  { %1883 = vmatpush.bf16.msra.mxu3 %v3050_v48 }
 0x933   :  { %v1353_v4 = vpop.f32.mrf.mxu3 }
 0x934   :  { %v1363_v9 = vadd.f32 %v1361_v6, %v1353_v4 }
 0x93b   :  { %v1355_v8 = vpop.f32.mrf.mxu3 }
 0x93c   :  { %v1364_v10 = vadd.f32 %v1362_v7, %v1355_v8 }
 0x93e   :  { %v1382_v11 = vpack.c.bf16 %v1364_v10, %v1363_v9 }
 0x940   :  { %1444 = vmatmul.bf16.vlgmr.msra.gmra.mxu0 %v1382_v11 }
 0x9bd   :  { %v1445_v32 = vpop.f32.mrf.mxu0 }
 0x9be   :  { %v1446_v26 = vadd.f32 %v3085_v25, %v1445_v32 }
 0x9c0   :  { %v1450_v20 = vmax.f32 %v1446_v26, 0.0 }
 0x9c5   :  { %v1447_v27 = vpop.f32.mrf.mxu0 }
 0x9c6   :  { %v1448_v18 = vadd.f32 %v3085_v25, %v1447_v27 }
 0x9c8   :  { %v1451_v41 = vmax.f32 %v1448_v18, 0.0 }
 0x9ca   :  { %v1469_v21 = vpack.c.bf16 %v1451_v41, %v1450_v20 }
 0x9cc   :  { %1531 = vmatmul.bf16.vlgmr.msrb.gmra.mxu3 %v1469_v21 }
 0xa4f   :  { %v1532_v35 = vpop.f32.mrf.mxu3 }
 0xa50   :  { %v3821_v38 = vadd.f32 %v3086_v56, %v1532_v35 }
 0xa57   :  { %v1534_v37 = vpop.f32.mrf.mxu3 }
 0xa58   :  { %v3823_v39 = vadd.f32 %v3086_v56, %v1534_v37 }
 0xa5a   :  { %v1553_v40 = vpack.c.bf16 %v3823_v39, %v3821_v38 }
 0xa5c   :  { %1614 = vmatmul.bf16.vlgmr.msra.gmra.mxu1 %v1553_v40 }
 0xad9   :  { %v1615_v50 = vpop.f32.mrf.mxu1 }
 0xada   :  { %v1616_v52 = vadd.f32 %v3087_v51, %v1615_v50  ;;  %v3049_v50 = vld [vmem:[%s4001_s21 + $0x30] sm:$0xff] }
 0xadb   :  { %1884 = vmatpush.bf16.msra.mxu3 %v3049_v50 }
 0xadc   :  { %v1620_v61 = vmax.f32 %v1616_v52, 0.0  ;;  %v3047_v52 = vld [vmem:[%s4001_s21 + $0x20] sm:$0xff] }
 0xae1   :  { %v1617_v55 = vpop.f32.mrf.mxu1 }
 0xae2   :  { %v1618_v60 = vadd.f32 %v3087_v51, %v1617_v55  ;;  %v3048_v51 = vld [vmem:[%s4001_s21 + $0x28] sm:$0xff]  ;;  %v3046_v55 = vld [vmem:[%s4001_s21 + $0x18] sm:$0xff] }
 0xae3   :  { %1885 = vmatpush.bf16.msra.mxu3 %v3048_v51 }
 0xae4   :  { %v1621_v62 = vmax.f32 %v1618_v60, 0.0  ;;  %v3089_v60 = vld [vmem:[%s4037_s9] ss:$0 sm:$0xff] }
 0xae5   :  { %vm1778_vm1 = vcmp.eq.s32.totalorder %v3394_v16, %v3089_v60  ;;  %v3043_v16 = vld [vmem:[%s4001_s21] sm:$0xff] }
 0xae6   :  { %v1638_v42 = vpack.c.bf16 %v1621_v62, %v1620_v61  ;;  %v3045_v61 = vld [vmem:[%s4001_s21 + $0x10] sm:$0xff]  ;;  %v3044_v62 = vld [vmem:[%s4001_s21 + $0x8] sm:$0xff] }
 0xae7   :  { %1886 = vmatpush.bf16.msra.mxu3 %v3047_v52 }
 0xae8   :  { %1699 = vmatmul.bf16.vlgmr.msra.gmra.mxu2 %v1638_v42 }
 0xaeb   :  { %1887 = vmatpush.bf16.msra.mxu3 %v3046_v55 }
 0xaef   :  { %1888 = vmatpush.bf16.msra.mxu3 %v3045_v61 }
 0xaf3   :  { %1889 = vmatpush.bf16.msra.mxu3 %v3044_v62 }
 0xaf7   :  { %1890 = vmatpush.bf16.msra.mxu3 %v3043_v16 }
 0xb6b   :  { %v1700_v54 = vpop.f32.mrf.mxu2 }
 0xb6c   :  { %v1701_v57 = vadd.f32 %v3088_v43, %v1700_v54 }
 0xb6e   :  { %1717 = vperm.xlu1 %3071, %v1701_v57  }
 0xb73   :  { %v1702_v58 = vpop.f32.mrf.mxu2 }
 0xb74   :  { %v1703_v59 = vadd.f32 %v3088_v43, %v1702_v58  ;;  %v1779_v58 = vsel %vm1778_vm1, 1.0, %v3115_v44  ;;  %v3041_v44 = vld [vmem:[%s4000_s20 + $0x30] sm:$0xff] }
 0xb76   :  { %1722 = vperm.xlu2 %3072, %v1703_v59   ;;  %v3042_v59 = vld [vmem:[%s4000_s20 + $0x38] sm:$0xff] }
 0xbd0   :  { %v1723_v1 = vpop.permute.xlu2 %1722 }
 0xbd1   :  { %v1726_v33 = vsel %vm1714_vm10, %v1723_v1, -1e+30  ;;  %v1780_v1 = vpack.c.bf16 %v1779_v58, %v1779_v58 }
 0xbd2   :  { %v1729_v4 = vsel %vm1727_vm11, %v1726_v33, -inf }
 0xbe0   :  { %v1718_v2 = vpop.permute.xlu1 %1717 }
 0xbe1   :  { %v1725_v3 = vsel %vm1713_vm12, %v1718_v2, -1e+30  ;;  %v3038_v2 = vld [vmem:[%s4000_s20 + $0x18] sm:$0xff] }
 0xbe2   :  { %v1728_v5 = vsel %vm1727_vm11, %v1725_v3, -inf }
 0xbe3   :  { %v1730_v6 = vmax.f32 %v1728_v5, %v1729_v4  ;;  %v3036_v4 = vld [vmem:[%s4000_s20 + $0x8] sm:$0xff]  ;;  %v3035_v5 = vld [vmem:[%s4000_s20] sm:$0xff] }
 0xbe5   :  { %v1731_v7 = vrot.slane %v1730_v6, 4 }
 0xbe7   :  { %v1732_v8 = vmax.f32 %v1730_v6, %v1731_v7  ;;  %v3058_v6 = vld [vmem:[%s4003_s23 + $0x38] sm:$0xff]  ;;  %v3057_v7 = vld [vmem:[%s4003_s23 + $0x30] sm:$0xff] }
 0xbe8   :  { %2032 = vmatpush.bf16.msrb.mxu1 %v3058_v6 }
 0xbe9   :  { %v1733_v9 = vrot.slane %v1732_v8, 2 }
 0xbeb   :  { %v1734_v10 = vmax.f32 %v1732_v8, %v1733_v9  ;;  %v3056_v8 = vld [vmem:[%s4003_s23 + $0x28] sm:$0xff]  ;;  %v3055_v9 = vld [vmem:[%s4003_s23 + $0x20] sm:$0xff] }
 0xbec   :  { %2033 = vmatpush.bf16.msrb.mxu1 %v3057_v7 }
 0xbed   :  { %v1735_v11 = vrot.slane %v1734_v10, 1 }
 0xbef   :  { %v1736_v12 = vmax.f32 %v1734_v10, %v1735_v11  ;;  %v3054_v10 = vld [vmem:[%s4003_s23 + $0x18] sm:$0xff]  ;;  %v3053_v11 = vld [vmem:[%s4003_s23 + $0x10] sm:$0xff] }
 0xbf0   :  { %2034 = vmatpush.bf16.msrb.mxu1 %v3056_v8 }
 0xbf1   :  { %v1737_v13 = vsub.f32 %v1725_v3, %v1736_v12  ;;  %v1738_v14 = vsub.f32 %v1726_v33, %v1736_v12  ;;  %v3039_v33 = vld [vmem:[%s4000_s20 + $0x20] sm:$0xff]  ;;  %v3037_v3 = vld [vmem:[%s4000_s20 + $0x10] sm:$0xff] }
 0xbf3   :  { %v1739_v15 = vmul.f32 1.442695, %v1737_v13  ;;  %v1741_v17 = vmul.f32 1.442695, %v1738_v14 }
 0xbf4   :  { %2035 = vmatpush.bf16.msrb.mxu1 %v3055_v9 }
 0xbf5   :  { %3093 = vpow2.f32 %v1739_v15 }
 0xbf6   :  { %3095 = vpow2.f32 %v1741_v17 }
 0xbf8   :  { %2036 = vmatpush.bf16.msrb.mxu1 %v3054_v10 }
 0xbfb   :  { %v3094_v19 = vpop.eup %3093 }
 0xbfc   :  { %v3096_v23 = vpop.eup %3095  ;;  %v1743_v24 = vsel %vm1713_vm12, %v3094_v19, 0.0  ;;  %2037 = vmatpush.bf16.msrb.mxu1 %v3053_v11  ;;  %v3052_v19 = vld [vmem:[%s4003_s23 + $0x8] sm:$0xff] }
 0xbfd   :  { %v1744_v29 = vsel %vm1714_vm10, %v3096_v23, 0.0  ;;  %v1745_v32 = vsel %vm1727_vm11, %v1743_v24, 0.0  ;;  %v3051_v23 = vld [vmem:[%s4003_s23] sm:$0xff] }
 0xbfe   :  { %v1746_v25 = vsel %vm1727_vm11, %v1744_v29, 0.0 }
 0xbff   :  { %v1747_v26 = vadd.f32 %v1746_v25, %v1745_v32  ;;  %v3064_v32 = vld [vmem:[%s4005_s25 + $0x28] sm:$0xff]  ;;  %v3063_v25 = vld [vmem:[%s4005_s25 + $0x20] sm:$0xff] }
 0xc00   :  { %2038 = vmatpush.bf16.msrb.mxu1 %v3052_v19 }
 0xc01   :  { %v1748_v27 = vrot.slane %v1747_v26, 4 }
 0xc03   :  { %v1749_v18 = vadd.f32 %v1748_v27, %v1747_v26  ;;  %v3062_v26 = vld [vmem:[%s4005_s25 + $0x18] sm:$0xff]  ;;  %v3061_v27 = vld [vmem:[%s4005_s25 + $0x10] sm:$0xff] }
 0xc04   :  { %2039 = vmatpush.bf16.msrb.mxu1 %v3051_v23 }
 0xc05   :  { %v1750_v20 = vrot.slane %v1749_v18, 2 }
 0xc07   :  { %v1751_v41 = vadd.f32 %v1750_v20, %v1749_v18  ;;  %v3090_v18 = vld [vmem:[%s4002_s22] ss:$0 sm:$0xff] }
 0xc09   :  { %v1752_v21 = vrot.slane %v1751_v41, 1 }
 0xc0b   :  { %v1753_v22 = vadd.f32 %v1752_v21, %v1751_v41 }
 0xc0d   :  { %3097 = vrcp.f32 %v1753_v22  ;;  %v1765_v31 = vand.u32 2147483648, %v1753_v22  ;;  %v1763_v36 = vand.u32 2147483647, %v1753_v22  ;;  %vm1759_vm14 = vweird.f32 %v1753_v22 }
 0xc0f   :  { %v1766_v35 = vor.u32 1.1754944e-38, %v1765_v31  ;;  %vm1764_vm0 = vcmp.eq.f32.partialorder %v1763_v36, 8.507059e+37  ;;  %v3059_v31 = vld [vmem:[%s4005_s25] sm:$0xff] }
 0xc13   :  { %v3098_v28 = vpop.eup %3097 }
 0xc14   :  { %v1755_v49 = vmul.f32 %v3098_v28, %v1753_v22  ;;  %vm1760_vm13 = vweird.f32 %v3098_v28 }
 0xc15   :  { %vm1761_vm15 = vmor %vm1759_vm14, %vm1760_vm13 }
 0xc16   :  { %v1756_v30 = vsub.f32 1.0, %v1755_v49 }
 0xc18   :  { %v1757_v53 = vmul.f32 %v3098_v28, %v1756_v30  ;;  %v3060_v30 = vld [vmem:[%s4005_s25 + $0x8] sm:$0xff] }
 0xc1a   :  { %v1758_v34 = vadd.f32 %v3098_v28, %v1757_v53  ;;  %v3091_v53 = vld [vmem:[%s4004_s24] ss:$0 sm:$0xff] }
 0xc1c   :  { %v1762_v56 = vsel %vm1761_vm15, %v3098_v28, %v1758_v34 }
 0xc1d   :  { %v1767_v37 = vsel %vm1764_vm0, %v1766_v35, %v1762_v56 }
 0xc1e   :  { %v1769_v40 = vmul.f32 %v1767_v37, %v1744_v29  ;;  %v1768_v45 = vmul.f32 %v1767_v37, %v1743_v24  ;;  %v3066_v24 = vld [vmem:[%s4005_s25 + $0x38] sm:$0xff]  ;;  %v3065_v29 = vld [vmem:[%s4005_s25 + $0x30] sm:$0xff] }
 0xc1f   :  { %2115 = vmatpush.bf16.msrb.mxu2 %v3066_v24 }
 0xc20   :  { %v1773_v46 = vsel %vm1727_vm11, %v1769_v40, 0.0  ;;  %v1770_v47 = vsel %vm1727_vm11, %v1768_v45, 0.0  ;;  %v3092_v40 = vld [vmem:[%s4006_s26] ss:$0 sm:$0xff] }
 0xc21   :  { %1774 = vadd.xlane.f32.xlu1 %v1773_v46  ;;  %1771 = vadd.xlane.f32.xlu0 %v1770_v47 }
 0xc23   :  { %2116 = vmatpush.bf16.msrb.mxu2 %v3065_v29 }
 0xc27   :  { %2117 = vmatpush.bf16.msrb.mxu2 %v3064_v32 }
 0xc2b   :  { %2118 = vmatpush.bf16.msrb.mxu2 %v3063_v25 }
 0xc2f   :  { %2119 = vmatpush.bf16.msrb.mxu2 %v3062_v26 }
 0xc33   :  { %2120 = vmatpush.bf16.msrb.mxu2 %v3061_v27 }
 0xc37   :  { %2121 = vmatpush.bf16.msrb.mxu2 %v3060_v30 }
 0xc3b   :  { %2122 = vmatpush.bf16.msrb.mxu2 %v3059_v31 }
 0xc94   :  { %v1775_v42 = vpop.xlane.xlu1 %1774  ;;  %v1772_v43 = vpop.xlane.xlu0 %1771 }
 0xc95   :  { %v1782_v54 = vmul.f32 %v1775_v42, %v3823_v39  ;;  %v1781_v57 = vmul.f32 %v1772_v43, %v3821_v38  ;;  %v1834_v39 = vpack.c.bf16 %v1817_v63, %v1817_v63  ;;  %v3040_v38 = vld [vmem:[%s4000_s20 + $0x28] sm:$0xff] }
 0xc97   :  { %v1783_v0 = vpack.c.bf16 %v1782_v54, %v1781_v57  ;;  %1891 = vmatmul.bf16.vlgmr.msra.gmra.mxu3 %v1834_v39 }
 0xc99   :  { %1794 = vmatpush.bf16.msrb.mxu0 %v1783_v0 }
 0xc9c   :  { %2786 = vmatmul.msk.bf16.vlgmr.msrb.gmra.mxu0 %vm330_vm2, %v1780_v1 }
 0xc9d   :  { %1944 = vmatpush.bf16.msra.mxu0 %v3042_v59 }
 0xca1   :  { %1945 = vmatpush.bf16.msra.mxu0 %v3041_v44 }
 0xca5   :  { %1946 = vmatpush.bf16.msra.mxu0 %v3040_v38 }
 0xca9   :  { %1947 = vmatpush.bf16.msra.mxu0 %v3039_v33 }
 0xcad   :  { %1948 = vmatpush.bf16.msra.mxu0 %v3038_v2 }
 0xcb1   :  { %1949 = vmatpush.bf16.msra.mxu0 %v3037_v3 }
 0xcb5   :  { %1950 = vmatpush.bf16.msra.mxu0 %v3036_v4 }
 0xcb9   :  { %1951 = vmatpush.bf16.msra.mxu0 %v3035_v5 }
 0xd19   :  { %v1796_v12 = vpop.f32.mrf.mxu0 }
 0xd1a   :  { %v1816_v13 = vpack.c.bf16 %v1796_v12, %v1796_v12  ;;  %v1892_v14 = vpop.f32.mrf.mxu3 }
 0xd1c   :  { %1952 = vmatmul.bf16.vlgmr.msra.gmra.mxu0 %v1816_v13 }
 0xd21   :  { %v1798_v15 = vpop.f32.mrf.mxu0 }
 0xd22   :  { %v1894_v17 = vpop.f32.mrf.mxu3 }
 0xd99   :  { %v1953_v20 = vpop.f32.mrf.mxu0 }
 0xd9a   :  { %v1954_v41 = vadd.f32 %v1953_v20, %v1892_v14 }
 0xd9c   :  { %v1961_v21 = vadd.f32 %v3090_v18, %v1954_v41 }
 0xd9e   :  { %v1962_v22 = vmax.f32 %v1961_v21, 0.0 }
 0xda0   :  { %v1979_v28 = vpack.c.bf16 %v1962_v22, %v1962_v22 }
 0xda1   :  { %v1955_v49 = vpop.f32.mrf.mxu0 }
 0xda2   :  { %2040 = vmatmul.bf16.vlgmr.msrb.gmra.mxu1 %v1979_v28 }
 0xe1f   :  { %v2041_v36 = vpop.f32.mrf.mxu1 }
 0xe20   :  { %v2042_v34 = vadd.f32 %v3091_v53, %v2041_v36 }
 0xe22   :  { %v2045_v35 = vmax.f32 %v2042_v34, 0.0 }
 0xe24   :  { %v2062_v56 = vpack.c.bf16 %v2045_v35, %v2045_v35 }
 0xe26   :  { %2123 = vmatmul.bf16.vlgmr.msrb.gmra.mxu2 %v2062_v56 }
 0xe27   :  { %v2043_v37 = vpop.f32.mrf.mxu1 }
 0xea9   :  { %v2124_v45 = vpop.f32.mrf.mxu2 }
 0xeaa   :  { %v2125_v46 = vadd.f32 %v3092_v40, %v2124_v45 }
 0xeac   :  { %2128 = vst [vmem:[%s4007_s27] sm:$0x3] %v2125_v46 }
 0xeb1   :  { %v2126_v47 = vpop.f32.mrf.mxu2 }
 0xeb2   :  { %2133 = vsyncpa [#allocation3], 1 }

</bundles_post_ra>
